<compile_context>
chip_gen: v7x
topology: tpu7x:2x2x1
jax: 0.10.0
libtpu: 0.0.40
codegen_flags: <defaults>
</compile_context>

<pallas_src>
import math
import functools

import jax
import jax.numpy as jnp
from jax import lax
from jax.experimental import pallas as pl
from jax.experimental.pallas import tpu as pltpu

# ---------------- config (small, consistent with the module) ----------------
VOCAB_SIZE = 128
N_EMBED = 32
N_HEAD = 4
N_LAYER = 2
MAX_SEQ_LEN = 8
LN_EPS = 1e-5  # PyTorch nn.LayerNorm default


# ---------------- in-kernel helpers ----------------
def _layernorm(x, g, b):
    mu = jnp.mean(x, axis=-1, keepdims=True)
    var = jnp.mean((x - mu) ** 2, axis=-1, keepdims=True)
    return (x - mu) * lax.rsqrt(var + LN_EPS) * g + b


def _gelu_exact(x):
    # nn.GELU() default is the exact (erf) formulation
    return 0.5 * x * (1.0 + lax.erf(x * (1.0 / math.sqrt(2.0))))


# ---------------- fused GPT forward kernel ----------------
def gpt_kernel(x_ref, wte_ref,
               ln1g_ref, ln1b_ref, wqkv_ref, bqkv_ref, wpr_ref, bpr_ref,
               ln2g_ref, ln2b_ref, wfc_ref, bfc_ref, wp2_ref, bp2_ref,
               lnfg_ref, lnfb_ref,
               logits_ref,
               *, n_layer, n_head, batch, seq):
    C = x_ref.shape[-1]
    BT = batch * seq
    D = C // n_head
    scale = 1.0 / math.sqrt(D)

    x = x_ref[...]                                           # (B*T, C) f32

    # causal mask (shared across layers/heads), broadcast over batch
    row = lax.broadcasted_iota(jnp.int32, (seq, seq), 0)
    col = lax.broadcasted_iota(jnp.int32, (seq, seq), 1)
    causal = (row >= col)[None, :, :]                        # (1, T, T)

    for l in range(n_layer):                                 # static unroll, L=2
        # ---- attention path ----
        h1 = _layernorm(x, ln1g_ref[l], ln1b_ref[l])         # (BT, C)
        qkv = jnp.dot(h1, wqkv_ref[l],
                      preferred_element_type=jnp.float32) + bqkv_ref[l]  # (BT, 3C)
        qkv = qkv.reshape(batch, seq, 3 * C)                 # (B, T, 3C)

        heads = []
        for hi in range(n_head):                             # static unroll, H=4
            qh = qkv[:, :, hi * D:(hi + 1) * D]              # (B, T, D)
            kh = qkv[:, :, C + hi * D:C + (hi + 1) * D]      # (B, T, D)
            vh = qkv[:, :, 2 * C + hi * D:2 * C + (hi + 1) * D]
            s = jnp.einsum('btd,bsd->bts', qh, kh,
                           preferred_element_type=jnp.float32) * scale
            s = jnp.where(causal, s, -1e30)
            s = s - jnp.max(s, axis=-1, keepdims=True)
            p = jnp.exp(s)
            p = p / jnp.sum(p, axis=-1, keepdims=True)
            heads.append(jnp.einsum('bts,bsd->btd', p, vh,
                                    preferred_element_type=jnp.float32))
        y = jnp.concatenate(heads, axis=-1).reshape(BT, C)   # (BT, C)

        y = jnp.dot(y, wpr_ref[l],
                    preferred_element_type=jnp.float32) + bpr_ref[l]
        x = x + y

        # ---- MLP path ----
        h2 = _layernorm(x, ln2g_ref[l], ln2b_ref[l])
        m = jnp.dot(h2, wfc_ref[l],
                    preferred_element_type=jnp.float32) + bfc_ref[l]
        m = _gelu_exact(m)
        m = jnp.dot(m, wp2_ref[l],
                    preferred_element_type=jnp.float32) + bp2_ref[l]
        x = x + m

    # ---- final LN + tied lm_head (contract C dims of hf and wte(V,C)) ----
    hf = _layernorm(x, lnfg_ref[...], lnfb_ref[...])
    logits = lax.dot_general(hf, wte_ref[...],
                             dimension_numbers=(((1,), (1,)), ((), ())),
                             preferred_element_type=jnp.float32)
    logits_ref[...] = logits.astype(logits_ref.dtype)        # (BT, V=128), lane-dense


# ---------------- wrapper ----------------
def _full_spec(a):
    nd = a.ndim
    return pl.BlockSpec(a.shape, lambda i, _nd=nd: (0,) * _nd)


def _gpt_forward_impl(idx, params):
    B, T = idx.shape
    C = N_EMBED
    # Embedding gather is glue (plain JAX, fused under jit); hot path is the kernel.
    x = params['wte'][idx] + params['wpe'][:T][None, :, :]   # (B, T, C) f32
    x = x.reshape(B * T, C).astype(jnp.float32)

    args = (x, params['wte'],
            params['ln1_g'], params['ln1_b'],
            params['w_qkv'], params['b_qkv'],
            params['w_proj'], params['b_proj'],
            params['ln2_g'], params['ln2_b'],
            params['w_fc'], params['b_fc'],
            params['w_proj2'], params['b_proj2'],
            params['lnf_g'], params['lnf_b'])

    logits = pl.pallas_call(
        functools.partial(gpt_kernel, n_layer=N_LAYER, n_head=N_HEAD,
                          batch=B, seq=T),
        out_shape=jax.ShapeDtypeStruct((B * T, VOCAB_SIZE), jnp.float32),
        grid=(1,),
        in_specs=[_full_spec(a) for a in args],
        out_specs=pl.BlockSpec((B * T, VOCAB_SIZE), lambda i: (0, 0)),
        compiler_params=pltpu.CompilerParams(
            dimension_semantics=("arbitrary",)),
    )(*args)
    return logits.reshape(B, T, VOCAB_SIZE)
    # TODO(synk): cross-entropy loss branch (targets is not None) not implemented;
    # forward here returns logits only (targets=None path).


gpt_forward = jax.jit(_gpt_forward_impl)


# ---------------- parameter init (deterministic, matching module shapes) ----
def init_params(key):
    C = N_EMBED
    std = 0.02
    proj_std = 0.02 / math.sqrt(2 * N_LAYER)
    keys = iter(jax.random.split(key, 8))

    def normal(shape, s):
        return s * jax.random.normal(next(keys), shape, dtype=jnp.float32)

    # weights stored as (in_features, out_features) so in-kernel matmul is x @ W + b
    # (equivalent to PyTorch Linear x @ W.T + b); per-layer params stacked on axis 0.
    return {
        'wte': normal((VOCAB_SIZE, C), std),       # tied: tokens_embed & lm_head
        'wpe': normal((MAX_SEQ_LEN, C), std),
        'lnf_g': jnp.ones((1, C), jnp.float32),
        'lnf_b': jnp.zeros((1, C), jnp.float32),
        'ln1_g': jnp.ones((N_LAYER, 1, C), jnp.float32),
        'ln1_b': jnp.zeros((N_LAYER, 1, C), jnp.float32),
        'ln2_g': jnp.ones((N_LAYER, 1, C), jnp.float32),
        'ln2_b': jnp.zeros((N_LAYER, 1, C), jnp.float32),
        'w_qkv': normal((N_LAYER, C, 3 * C), std),
        'b_qkv': jnp.zeros((N_LAYER, 1, 3 * C), jnp.float32),
        'w_proj': normal((N_LAYER, C, C), proj_std),
        'b_proj': jnp.zeros((N_LAYER, 1, C), jnp.float32),
        'w_fc': normal((N_LAYER, C, 4 * C), std),
        'b_fc': jnp.zeros((N_LAYER, 1, 4 * C), jnp.float32),
        'w_proj2': normal((N_LAYER, 4 * C, C), proj_std),
        'b_proj2': jnp.zeros((N_LAYER, 1, C), jnp.float32),
    }


if __name__ == "__main__":
    key = jax.random.PRNGKey(0)
    pkey, dkey = jax.random.split(key)
    params = init_params(pkey)

    batch, seq = 2, 8
    idx = jax.random.randint(dkey, (batch, seq), 0, VOCAB_SIZE, dtype=jnp.int32)

    logits = gpt_forward(idx, params)
    jax.block_until_ready(logits)
    assert logits.shape == (batch, seq, VOCAB_SIZE)
    assert bool(jnp.all(jnp.isfinite(logits)))
    print("KERNEL_OK")
</pallas_src>

<mosaic_0001>
module attributes {stable_mosaic.version = 11 : i64} {
  func.func @gpt_kernel(%arg0: i32, %arg1: memref<16x32xf32, #tpu.memory_space<vmem>>, %arg2: memref<128x32xf32, #tpu.memory_space<vmem>>, %arg3: memref<2x1x32xf32, #tpu.memory_space<vmem>>, %arg4: memref<2x1x32xf32, #tpu.memory_space<vmem>>, %arg5: memref<2x32x96xf32, #tpu.memory_space<vmem>>, %arg6: memref<2x1x96xf32, #tpu.memory_space<vmem>>, %arg7: memref<2x32x32xf32, #tpu.memory_space<vmem>>, %arg8: memref<2x1x32xf32, #tpu.memory_space<vmem>>, %arg9: memref<2x1x32xf32, #tpu.memory_space<vmem>>, %arg10: memref<2x1x32xf32, #tpu.memory_space<vmem>>, %arg11: memref<2x32x128xf32, #tpu.memory_space<vmem>>, %arg12: memref<2x1x128xf32, #tpu.memory_space<vmem>>, %arg13: memref<2x128x32xf32, #tpu.memory_space<vmem>>, %arg14: memref<2x1x32xf32, #tpu.memory_space<vmem>>, %arg15: memref<1x32xf32, #tpu.memory_space<vmem>>, %arg16: memref<1x32xf32, #tpu.memory_space<vmem>>, %arg17: memref<16x128xf32, #tpu.memory_space<vmem>>) attributes {dimension_semantics = [#tpu.dimension_semantics<arbitrary>], iteration_bounds = array<i64: 1>, scalar_prefetch = 0 : i64, scratch_operands = 0 : i64, tpu.core_type = #tpu.core_type<tc>, window_params = [{pipeline_mode = #tpu.pipeline_mode<synchronous>, transform_indices = @transform_0, window_bounds = array<i64: 16, 32>}, {pipeline_mode = #tpu.pipeline_mode<synchronous>, transform_indices = @transform_1, window_bounds = array<i64: 128, 32>}, {pipeline_mode = #tpu.pipeline_mode<synchronous>, transform_indices = @transform_2, window_bounds = array<i64: 2, 1, 32>}, {pipeline_mode = #tpu.pipeline_mode<synchronous>, transform_indices = @transform_3, window_bounds = array<i64: 2, 1, 32>}, {pipeline_mode = #tpu.pipeline_mode<synchronous>, transform_indices = @transform_4, window_bounds = array<i64: 2, 32, 96>}, {pipeline_mode = #tpu.pipeline_mode<synchronous>, transform_indices = @transform_5, window_bounds = array<i64: 2, 1, 96>}, {pipeline_mode = #tpu.pipeline_mode<synchronous>, transform_indices = @transform_6, window_bounds = array<i64: 2, 32, 32>}, {pipeline_mode = #tpu.pipeline_mode<synchronous>, transform_indices = @transform_7, window_bounds = array<i64: 2, 1, 32>}, {pipeline_mode = #tpu.pipeline_mode<synchronous>, transform_indices = @transform_8, window_bounds = array<i64: 2, 1, 32>}, {pipeline_mode = #tpu.pipeline_mode<synchronous>, transform_indices = @transform_9, window_bounds = array<i64: 2, 1, 32>}, {pipeline_mode = #tpu.pipeline_mode<synchronous>, transform_indices = @transform_10, window_bounds = array<i64: 2, 32, 128>}, {pipeline_mode = #tpu.pipeline_mode<synchronous>, transform_indices = @transform_11, window_bounds = array<i64: 2, 1, 128>}, {pipeline_mode = #tpu.pipeline_mode<synchronous>, transform_indices = @transform_12, window_bounds = array<i64: 2, 128, 32>}, {pipeline_mode = #tpu.pipeline_mode<synchronous>, transform_indices = @transform_13, window_bounds = array<i64: 2, 1, 32>}, {pipeline_mode = #tpu.pipeline_mode<synchronous>, transform_indices = @transform_14, window_bounds = array<i64: 1, 32>}, {pipeline_mode = #tpu.pipeline_mode<synchronous>, transform_indices = @transform_15, window_bounds = array<i64: 1, 32>}, {pipeline_mode = #tpu.pipeline_mode<synchronous>, transform_indices = @transform_16, window_bounds = array<i64: 16, 128>}]} {
    %c0 = arith.constant 0 : index
    %c0_0 = arith.constant 0 : index
    %0 = vector.load %arg1[%c0, %c0_0] : memref<16x32xf32, #tpu.memory_space<vmem>>, vector<16x32xf32>
    %1 = tpu.iota {dimensions = array<i32: 0>} : vector<8x8xi32>
    %2 = tpu.iota {dimensions = array<i32: 1>} : vector<8x8xi32>
    %3 = arith.cmpi sge, %1, %2 : vector<8x8xi32>
    %4 = vector.shape_cast %3 : vector<8x8xi1> to vector<1x8x8xi1>
    %c0_1 = arith.constant 0 : index
    %c0_2 = arith.constant 0 : index
    %c0_3 = arith.constant 0 : index
    %5 = vector.load %arg3[%c0_1, %c0_2, %c0_3] : memref<2x1x32xf32, #tpu.memory_space<vmem>>, vector<1x1x32xf32>
    %6 = vector.shape_cast %5 : vector<1x1x32xf32> to vector<1x32xf32>
    %c0_4 = arith.constant 0 : index
    %c0_5 = arith.constant 0 : index
    %c0_6 = arith.constant 0 : index
    %7 = vector.load %arg4[%c0_4, %c0_5, %c0_6] : memref<2x1x32xf32, #tpu.memory_space<vmem>>, vector<1x1x32xf32>
    %8 = vector.shape_cast %7 : vector<1x1x32xf32> to vector<1x32xf32>
    %cst = arith.constant dense<0.000000e+00> : vector<16xf32>
    %9 = vector.multi_reduction <add>, %0, %cst [1] : vector<16x32xf32> to vector<16xf32>
    %10 = vector.shape_cast %9 : vector<16xf32> to vector<16x1xf32>
    %cst_7 = arith.constant 3.200000e+01 : f32
    %11 = vector.broadcast %cst_7 : f32 to vector<16x1xf32>
    %12 = arith.divf %10, %11 : vector<16x1xf32>
    %13 = vector.broadcast %12 : vector<16x1xf32> to vector<16x32xf32>
    %14 = arith.subf %0, %13 : vector<16x32xf32>
    %15 = arith.mulf %14, %14 : vector<16x32xf32>
    %cst_8 = arith.constant dense<0.000000e+00> : vector<16xf32>
    %16 = vector.multi_reduction <add>, %15, %cst_8 [1] : vector<16x32xf32> to vector<16xf32>
    %17 = vector.shape_cast %16 : vector<16xf32> to vector<16x1xf32>
    %cst_9 = arith.constant 3.200000e+01 : f32
    %18 = vector.broadcast %cst_9 : f32 to vector<16x1xf32>
    %19 = arith.divf %17, %18 : vector<16x1xf32>
    %20 = vector.broadcast %12 : vector<16x1xf32> to vector<16x32xf32>
    %21 = arith.subf %0, %20 : vector<16x32xf32>
    %cst_10 = arith.constant 9.99999974E-6 : f32
    %22 = vector.broadcast %cst_10 : f32 to vector<16x1xf32>
    %23 = arith.addf %19, %22 : vector<16x1xf32>
    %24 = math.rsqrt %23 : vector<16x1xf32>
    %25 = vector.broadcast %24 : vector<16x1xf32> to vector<16x32xf32>
    %26 = arith.mulf %21, %25 : vector<16x32xf32>
    %27 = vector.broadcast %6 : vector<1x32xf32> to vector<16x32xf32>
    %28 = arith.mulf %26, %27 : vector<16x32xf32>
    %29 = vector.broadcast %8 : vector<1x32xf32> to vector<16x32xf32>
    %30 = arith.addf %28, %29 : vector<16x32xf32>
    %c0_11 = arith.constant 0 : index
    %c0_12 = arith.constant 0 : index
    %c0_13 = arith.constant 0 : index
    %31 = vector.load %arg5[%c0_11, %c0_12, %c0_13] : memref<2x32x96xf32, #tpu.memory_space<vmem>>, vector<1x32x96xf32>
    %32 = vector.shape_cast %31 : vector<1x32x96xf32> to vector<32x96xf32>
    %cst_14 = arith.constant dense<0.000000e+00> : vector<16x96xf32>
    %33 = tpu.matmul %30, %32, %cst_14 {dimension_numbers = #tpu.dot_dimension_numbers<[1], [0], [0], [1], [0, 0, 1, 1], [], []>} : vector<16x32xf32>, vector<32x96xf32>, vector<16x96xf32> -> vector<16x96xf32>
    %c0_15 = arith.constant 0 : index
    %c0_16 = arith.constant 0 : index
    %c0_17 = arith.constant 0 : index
    %34 = vector.load %arg6[%c0_15, %c0_16, %c0_17] : memref<2x1x96xf32, #tpu.memory_space<vmem>>, vector<1x1x96xf32>
    %35 = vector.shape_cast %34 : vector<1x1x96xf32> to vector<1x96xf32>
    %36 = vector.broadcast %35 : vector<1x96xf32> to vector<16x96xf32>
    %37 = arith.addf %33, %36 : vector<16x96xf32>
    %38 = vector.shape_cast %37 : vector<16x96xf32> to vector<2x8x96xf32>
    %39 = vector.extract_strided_slice %38 {offsets = [0, 0, 0], sizes = [2, 8, 8], strides = [1, 1, 1]} : vector<2x8x96xf32> to vector<2x8x8xf32>
    %40 = vector.extract_strided_slice %38 {offsets = [0, 0, 32], sizes = [2, 8, 8], strides = [1, 1, 1]} : vector<2x8x96xf32> to vector<2x8x8xf32>
    %41 = vector.extract_strided_slice %38 {offsets = [0, 0, 64], sizes = [2, 8, 8], strides = [1, 1, 1]} : vector<2x8x96xf32> to vector<2x8x8xf32>
    "tpu.trace_start"() <{level = 10 : i32, message = "btd,bsd->bts"}> : () -> ()
    %cst_18 = arith.constant dense<0.000000e+00> : vector<2x8x8xf32>
    %42 = tpu.matmul %39, %40, %cst_18 {dimension_numbers = #tpu.dot_dimension_numbers<[2], [2], [1], [1], [0, 0, 0, 1, 1, 1], [0], [0]>} : vector<2x8x8xf32>, vector<2x8x8xf32>, vector<2x8x8xf32> -> vector<2x8x8xf32>
    "tpu.trace_stop"() : () -> ()
    %cst_19 = arith.constant 0.353553385 : f32
    %43 = vector.broadcast %cst_19 : f32 to vector<2x8x8xf32>
    %44 = arith.mulf %42, %43 : vector<2x8x8xf32>
    %cst_20 = arith.constant -1.000000e+30 : f32
    %45 = vector.shape_cast %4 : vector<1x8x8xi1> to vector<1x8x8xi1>
    %46 = vector.broadcast %45 : vector<1x8x8xi1> to vector<2x8x8xi1>
    %47 = vector.broadcast %cst_20 : f32 to vector<2x8x8xf32>
    %48 = arith.select %46, %44, %47 : vector<2x8x8xi1>, vector<2x8x8xf32>
    %cst_21 = arith.constant dense<0xFF800000> : vector<2x8xf32>
    %49 = vector.multi_reduction <maximumf>, %48, %cst_21 [2] : vector<2x8x8xf32> to vector<2x8xf32>
    %50 = vector.shape_cast %49 : vector<2x8xf32> to vector<2x8x1xf32>
    %51 = vector.broadcast %50 : vector<2x8x1xf32> to vector<2x8x8xf32>
    %52 = arith.subf %48, %51 : vector<2x8x8xf32>
    %53 = math.exp %52 : vector<2x8x8xf32>
    %cst_22 = arith.constant dense<0.000000e+00> : vector<2x8xf32>
    %54 = vector.multi_reduction <add>, %53, %cst_22 [2] : vector<2x8x8xf32> to vector<2x8xf32>
    %55 = vector.shape_cast %54 : vector<2x8xf32> to vector<2x8x1xf32>
    %56 = vector.broadcast %55 : vector<2x8x1xf32> to vector<2x8x8xf32>
    %57 = arith.divf %53, %56 : vector<2x8x8xf32>
    "tpu.trace_start"() <{level = 10 : i32, message = "bts,bsd->btd"}> : () -> ()
    %cst_23 = arith.constant dense<0.000000e+00> : vector<2x8x8xf32>
    %58 = tpu.matmul %57, %41, %cst_23 {dimension_numbers = #tpu.dot_dimension_numbers<[2], [1], [1], [2], [0, 0, 0, 1, 1, 2], [0], [0]>} : vector<2x8x8xf32>, vector<2x8x8xf32>, vector<2x8x8xf32> -> vector<2x8x8xf32>
    "tpu.trace_stop"() : () -> ()
    %59 = vector.extract_strided_slice %38 {offsets = [0, 0, 8], sizes = [2, 8, 8], strides = [1, 1, 1]} : vector<2x8x96xf32> to vector<2x8x8xf32>
    %60 = vector.extract_strided_slice %38 {offsets = [0, 0, 40], sizes = [2, 8, 8], strides = [1, 1, 1]} : vector<2x8x96xf32> to vector<2x8x8xf32>
    %61 = vector.extract_strided_slice %38 {offsets = [0, 0, 72], sizes = [2, 8, 8], strides = [1, 1, 1]} : vector<2x8x96xf32> to vector<2x8x8xf32>
    "tpu.trace_start"() <{level = 10 : i32, message = "btd,bsd->bts"}> : () -> ()
    %cst_24 = arith.constant dense<0.000000e+00> : vector<2x8x8xf32>
    %62 = tpu.matmul %59, %60, %cst_24 {dimension_numbers = #tpu.dot_dimension_numbers<[2], [2], [1], [1], [0, 0, 0, 1, 1, 1], [0], [0]>} : vector<2x8x8xf32>, vector<2x8x8xf32>, vector<2x8x8xf32> -> vector<2x8x8xf32>
    "tpu.trace_stop"() : () -> ()
    %cst_25 = arith.constant 0.353553385 : f32
    %63 = vector.broadcast %cst_25 : f32 to vector<2x8x8xf32>
    %64 = arith.mulf %62, %63 : vector<2x8x8xf32>
    %cst_26 = arith.constant -1.000000e+30 : f32
    %65 = vector.shape_cast %4 : vector<1x8x8xi1> to vector<1x8x8xi1>
    %66 = vector.broadcast %65 : vector<1x8x8xi1> to vector<2x8x8xi1>
    %67 = vector.broadcast %cst_26 : f32 to vector<2x8x8xf32>
    %68 = arith.select %66, %64, %67 : vector<2x8x8xi1>, vector<2x8x8xf32>
    %cst_27 = arith.constant dense<0xFF800000> : vector<2x8xf32>
    %69 = vector.multi_reduction <maximumf>, %68, %cst_27 [2] : vector<2x8x8xf32> to vector<2x8xf32>
    %70 = vector.shape_cast %69 : vector<2x8xf32> to vector<2x8x1xf32>
    %71 = vector.broadcast %70 : vector<2x8x1xf32> to vector<2x8x8xf32>
    %72 = arith.subf %68, %71 : vector<2x8x8xf32>
    %73 = math.exp %72 : vector<2x8x8xf32>
    %cst_28 = arith.constant dense<0.000000e+00> : vector<2x8xf32>
    %74 = vector.multi_reduction <add>, %73, %cst_28 [2] : vector<2x8x8xf32> to vector<2x8xf32>
    %75 = vector.shape_cast %74 : vector<2x8xf32> to vector<2x8x1xf32>
    %76 = vector.broadcast %75 : vector<2x8x1xf32> to vector<2x8x8xf32>
    %77 = arith.divf %73, %76 : vector<2x8x8xf32>
    "tpu.trace_start"() <{level = 10 : i32, message = "bts,bsd->btd"}> : () -> ()
    %cst_29 = arith.constant dense<0.000000e+00> : vector<2x8x8xf32>
    %78 = tpu.matmul %77, %61, %cst_29 {dimension_numbers = #tpu.dot_dimension_numbers<[2], [1], [1], [2], [0, 0, 0, 1, 1, 2], [0], [0]>} : vector<2x8x8xf32>, vector<2x8x8xf32>, vector<2x8x8xf32> -> vector<2x8x8xf32>
    "tpu.trace_stop"() : () -> ()
    %79 = vector.extract_strided_slice %38 {offsets = [0, 0, 16], sizes = [2, 8, 8], strides = [1, 1, 1]} : vector<2x8x96xf32> to vector<2x8x8xf32>
    %80 = vector.extract_strided_slice %38 {offsets = [0, 0, 48], sizes = [2, 8, 8], strides = [1, 1, 1]} : vector<2x8x96xf32> to vector<2x8x8xf32>
    %81 = vector.extract_strided_slice %38 {offsets = [0, 0, 80], sizes = [2, 8, 8], strides = [1, 1, 1]} : vector<2x8x96xf32> to vector<2x8x8xf32>
    "tpu.trace_start"() <{level = 10 : i32, message = "btd,bsd->bts"}> : () -> ()
    %cst_30 = arith.constant dense<0.000000e+00> : vector<2x8x8xf32>
    %82 = tpu.matmul %79, %80, %cst_30 {dimension_numbers = #tpu.dot_dimension_numbers<[2], [2], [1], [1], [0, 0, 0, 1, 1, 1], [0], [0]>} : vector<2x8x8xf32>, vector<2x8x8xf32>, vector<2x8x8xf32> -> vector<2x8x8xf32>
    "tpu.trace_stop"() : () -> ()
    %cst_31 = arith.constant 0.353553385 : f32
    %83 = vector.broadcast %cst_31 : f32 to vector<2x8x8xf32>
    %84 = arith.mulf %82, %83 : vector<2x8x8xf32>
    %cst_32 = arith.constant -1.000000e+30 : f32
    %85 = vector.shape_cast %4 : vector<1x8x8xi1> to vector<1x8x8xi1>
    %86 = vector.broadcast %85 : vector<1x8x8xi1> to vector<2x8x8xi1>
    %87 = vector.broadcast %cst_32 : f32 to vector<2x8x8xf32>
    %88 = arith.select %86, %84, %87 : vector<2x8x8xi1>, vector<2x8x8xf32>
    %cst_33 = arith.constant dense<0xFF800000> : vector<2x8xf32>
    %89 = vector.multi_reduction <maximumf>, %88, %cst_33 [2] : vector<2x8x8xf32> to vector<2x8xf32>
    %90 = vector.shape_cast %89 : vector<2x8xf32> to vector<2x8x1xf32>
    %91 = vector.broadcast %90 : vector<2x8x1xf32> to vector<2x8x8xf32>
    %92 = arith.subf %88, %91 : vector<2x8x8xf32>
    %93 = math.exp %92 : vector<2x8x8xf32>
    %cst_34 = arith.constant dense<0.000000e+00> : vector<2x8xf32>
    %94 = vector.multi_reduction <add>, %93, %cst_34 [2] : vector<2x8x8xf32> to vector<2x8xf32>
    %95 = vector.shape_cast %94 : vector<2x8xf32> to vector<2x8x1xf32>
    %96 = vector.broadcast %95 : vector<2x8x1xf32> to vector<2x8x8xf32>
    %97 = arith.divf %93, %96 : vector<2x8x8xf32>
    "tpu.trace_start"() <{level = 10 : i32, message = "bts,bsd->btd"}> : () -> ()
    %cst_35 = arith.constant dense<0.000000e+00> : vector<2x8x8xf32>
    %98 = tpu.matmul %97, %81, %cst_35 {dimension_numbers = #tpu.dot_dimension_numbers<[2], [1], [1], [2], [0, 0, 0, 1, 1, 2], [0], [0]>} : vector<2x8x8xf32>, vector<2x8x8xf32>, vector<2x8x8xf32> -> vector<2x8x8xf32>
    "tpu.trace_stop"() : () -> ()
    %99 = vector.extract_strided_slice %38 {offsets = [0, 0, 24], sizes = [2, 8, 8], strides = [1, 1, 1]} : vector<2x8x96xf32> to vector<2x8x8xf32>
    %100 = vector.extract_strided_slice %38 {offsets = [0, 0, 56], sizes = [2, 8, 8], strides = [1, 1, 1]} : vector<2x8x96xf32> to vector<2x8x8xf32>
    %101 = vector.extract_strided_slice %38 {offsets = [0, 0, 88], sizes = [2, 8, 8], strides = [1, 1, 1]} : vector<2x8x96xf32> to vector<2x8x8xf32>
    "tpu.trace_start"() <{level = 10 : i32, message = "btd,bsd->bts"}> : () -> ()
    %cst_36 = arith.constant dense<0.000000e+00> : vector<2x8x8xf32>
    %102 = tpu.matmul %99, %100, %cst_36 {dimension_numbers = #tpu.dot_dimension_numbers<[2], [2], [1], [1], [0, 0, 0, 1, 1, 1], [0], [0]>} : vector<2x8x8xf32>, vector<2x8x8xf32>, vector<2x8x8xf32> -> vector<2x8x8xf32>
    "tpu.trace_stop"() : () -> ()
    %cst_37 = arith.constant 0.353553385 : f32
    %103 = vector.broadcast %cst_37 : f32 to vector<2x8x8xf32>
    %104 = arith.mulf %102, %103 : vector<2x8x8xf32>
    %cst_38 = arith.constant -1.000000e+30 : f32
    %105 = vector.shape_cast %4 : vector<1x8x8xi1> to vector<1x8x8xi1>
    %106 = vector.broadcast %105 : vector<1x8x8xi1> to vector<2x8x8xi1>
    %107 = vector.broadcast %cst_38 : f32 to vector<2x8x8xf32>
    %108 = arith.select %106, %104, %107 : vector<2x8x8xi1>, vector<2x8x8xf32>
    %cst_39 = arith.constant dense<0xFF800000> : vector<2x8xf32>
    %109 = vector.multi_reduction <maximumf>, %108, %cst_39 [2] : vector<2x8x8xf32> to vector<2x8xf32>
    %110 = vector.shape_cast %109 : vector<2x8xf32> to vector<2x8x1xf32>
    %111 = vector.broadcast %110 : vector<2x8x1xf32> to vector<2x8x8xf32>
    %112 = arith.subf %108, %111 : vector<2x8x8xf32>
    %113 = math.exp %112 : vector<2x8x8xf32>
    %cst_40 = arith.constant dense<0.000000e+00> : vector<2x8xf32>
    %114 = vector.multi_reduction <add>, %113, %cst_40 [2] : vector<2x8x8xf32> to vector<2x8xf32>
    %115 = vector.shape_cast %114 : vector<2x8xf32> to vector<2x8x1xf32>
    %116 = vector.broadcast %115 : vector<2x8x1xf32> to vector<2x8x8xf32>
    %117 = arith.divf %113, %116 : vector<2x8x8xf32>
    "tpu.trace_start"() <{level = 10 : i32, message = "bts,bsd->btd"}> : () -> ()
    %cst_41 = arith.constant dense<0.000000e+00> : vector<2x8x8xf32>
    %118 = tpu.matmul %117, %101, %cst_41 {dimension_numbers = #tpu.dot_dimension_numbers<[2], [1], [1], [2], [0, 0, 0, 1, 1, 2], [0], [0]>} : vector<2x8x8xf32>, vector<2x8x8xf32>, vector<2x8x8xf32> -> vector<2x8x8xf32>
    "tpu.trace_stop"() : () -> ()
    %119 = tpu.concatenate %58, %78, %98, %118 in 2 : vector<2x8x8xf32>, vector<2x8x8xf32>, vector<2x8x8xf32>, vector<2x8x8xf32> -> vector<2x8x32xf32>
    %120 = vector.shape_cast %119 : vector<2x8x32xf32> to vector<16x32xf32>
    %c0_42 = arith.constant 0 : index
    %c0_43 = arith.constant 0 : index
    %c0_44 = arith.constant 0 : index
    %121 = vector.load %arg7[%c0_42, %c0_43, %c0_44] : memref<2x32x32xf32, #tpu.memory_space<vmem>>, vector<1x32x32xf32>
    %122 = vector.shape_cast %121 : vector<1x32x32xf32> to vector<32x32xf32>
    %cst_45 = arith.constant dense<0.000000e+00> : vector<16x32xf32>
    %123 = tpu.matmul %120, %122, %cst_45 {dimension_numbers = #tpu.dot_dimension_numbers<[1], [0], [0], [1], [0, 0, 1, 1], [], []>} : vector<16x32xf32>, vector<32x32xf32>, vector<16x32xf32> -> vector<16x32xf32>
    %c0_46 = arith.constant 0 : index
    %c0_47 = arith.constant 0 : index
    %c0_48 = arith.constant 0 : index
    %124 = vector.load %arg8[%c0_46, %c0_47, %c0_48] : memref<2x1x32xf32, #tpu.memory_space<vmem>>, vector<1x1x32xf32>
    %125 = vector.shape_cast %124 : vector<1x1x32xf32> to vector<1x32xf32>
    %126 = vector.broadcast %125 : vector<1x32xf32> to vector<16x32xf32>
    %127 = arith.addf %123, %126 : vector<16x32xf32>
    %128 = arith.addf %0, %127 : vector<16x32xf32>
    %c0_49 = arith.constant 0 : index
    %c0_50 = arith.constant 0 : index
    %c0_51 = arith.constant 0 : index
    %129 = vector.load %arg9[%c0_49, %c0_50, %c0_51] : memref<2x1x32xf32, #tpu.memory_space<vmem>>, vector<1x1x32xf32>
    %130 = vector.shape_cast %129 : vector<1x1x32xf32> to vector<1x32xf32>
    %c0_52 = arith.constant 0 : index
    %c0_53 = arith.constant 0 : index
    %c0_54 = arith.constant 0 : index
    %131 = vector.load %arg10[%c0_52, %c0_53, %c0_54] : memref<2x1x32xf32, #tpu.memory_space<vmem>>, vector<1x1x32xf32>
    %132 = vector.shape_cast %131 : vector<1x1x32xf32> to vector<1x32xf32>
    %cst_55 = arith.constant dense<0.000000e+00> : vector<16xf32>
    %133 = vector.multi_reduction <add>, %128, %cst_55 [1] : vector<16x32xf32> to vector<16xf32>
    %134 = vector.shape_cast %133 : vector<16xf32> to vector<16x1xf32>
    %cst_56 = arith.constant 3.200000e+01 : f32
    %135 = vector.broadcast %cst_56 : f32 to vector<16x1xf32>
    %136 = arith.divf %134, %135 : vector<16x1xf32>
    %137 = vector.broadcast %136 : vector<16x1xf32> to vector<16x32xf32>
    %138 = arith.subf %128, %137 : vector<16x32xf32>
    %139 = arith.mulf %138, %138 : vector<16x32xf32>
    %cst_57 = arith.constant dense<0.000000e+00> : vector<16xf32>
    %140 = vector.multi_reduction <add>, %139, %cst_57 [1] : vector<16x32xf32> to vector<16xf32>
    %141 = vector.shape_cast %140 : vector<16xf32> to vector<16x1xf32>
    %cst_58 = arith.constant 3.200000e+01 : f32
    %142 = vector.broadcast %cst_58 : f32 to vector<16x1xf32>
    %143 = arith.divf %141, %142 : vector<16x1xf32>
    %144 = vector.broadcast %136 : vector<16x1xf32> to vector<16x32xf32>
    %145 = arith.subf %128, %144 : vector<16x32xf32>
    %cst_59 = arith.constant 9.99999974E-6 : f32
    %146 = vector.broadcast %cst_59 : f32 to vector<16x1xf32>
    %147 = arith.addf %143, %146 : vector<16x1xf32>
    %148 = math.rsqrt %147 : vector<16x1xf32>
    %149 = vector.broadcast %148 : vector<16x1xf32> to vector<16x32xf32>
    %150 = arith.mulf %145, %149 : vector<16x32xf32>
    %151 = vector.broadcast %130 : vector<1x32xf32> to vector<16x32xf32>
    %152 = arith.mulf %150, %151 : vector<16x32xf32>
    %153 = vector.broadcast %132 : vector<1x32xf32> to vector<16x32xf32>
    %154 = arith.addf %152, %153 : vector<16x32xf32>
    %c0_60 = arith.constant 0 : index
    %c0_61 = arith.constant 0 : index
    %c0_62 = arith.constant 0 : index
    %155 = vector.load %arg11[%c0_60, %c0_61, %c0_62] : memref<2x32x128xf32, #tpu.memory_space<vmem>>, vector<1x32x128xf32>
    %156 = vector.shape_cast %155 : vector<1x32x128xf32> to vector<32x128xf32>
    %cst_63 = arith.constant dense<0.000000e+00> : vector<16x128xf32>
    %157 = tpu.matmul %154, %156, %cst_63 {dimension_numbers = #tpu.dot_dimension_numbers<[1], [0], [0], [1], [0, 0, 1, 1], [], []>} : vector<16x32xf32>, vector<32x128xf32>, vector<16x128xf32> -> vector<16x128xf32>
    %c0_64 = arith.constant 0 : index
    %c0_65 = arith.constant 0 : index
    %c0_66 = arith.constant 0 : index
    %158 = vector.load %arg12[%c0_64, %c0_65, %c0_66] : memref<2x1x128xf32, #tpu.memory_space<vmem>>, vector<1x1x128xf32>
    %159 = vector.shape_cast %158 : vector<1x1x128xf32> to vector<1x128xf32>
    %160 = vector.broadcast %159 : vector<1x128xf32> to vector<16x128xf32>
    %161 = arith.addf %157, %160 : vector<16x128xf32>
    %cst_67 = arith.constant 5.000000e-01 : f32
    %162 = vector.broadcast %cst_67 : f32 to vector<16x128xf32>
    %163 = arith.mulf %162, %161 : vector<16x128xf32>
    %cst_68 = arith.constant 0.707106769 : f32
    %164 = vector.broadcast %cst_68 : f32 to vector<16x128xf32>
    %165 = arith.mulf %161, %164 : vector<16x128xf32>
    %166 = math.erf %165 : vector<16x128xf32>
    %cst_69 = arith.constant 1.000000e+00 : f32
    %167 = vector.broadcast %cst_69 : f32 to vector<16x128xf32>
    %168 = arith.addf %167, %166 : vector<16x128xf32>
    %169 = arith.mulf %163, %168 : vector<16x128xf32>
    %c0_70 = arith.constant 0 : index
    %c0_71 = arith.constant 0 : index
    %c0_72 = arith.constant 0 : index
    %170 = vector.load %arg13[%c0_70, %c0_71, %c0_72] : memref<2x128x32xf32, #tpu.memory_space<vmem>>, vector<1x128x32xf32>
    %171 = vector.shape_cast %170 : vector<1x128x32xf32> to vector<128x32xf32>
    %cst_73 = arith.constant dense<0.000000e+00> : vector<16x32xf32>
    %172 = tpu.matmul %169, %171, %cst_73 {dimension_numbers = #tpu.dot_dimension_numbers<[1], [0], [0], [1], [0, 0, 1, 1], [], []>} : vector<16x128xf32>, vector<128x32xf32>, vector<16x32xf32> -> vector<16x32xf32>
    %c0_74 = arith.constant 0 : index
    %c0_75 = arith.constant 0 : index
    %c0_76 = arith.constant 0 : index
    %173 = vector.load %arg14[%c0_74, %c0_75, %c0_76] : memref<2x1x32xf32, #tpu.memory_space<vmem>>, vector<1x1x32xf32>
    %174 = vector.shape_cast %173 : vector<1x1x32xf32> to vector<1x32xf32>
    %175 = vector.broadcast %174 : vector<1x32xf32> to vector<16x32xf32>
    %176 = arith.addf %172, %175 : vector<16x32xf32>
    %177 = arith.addf %128, %176 : vector<16x32xf32>
    %c1 = arith.constant 1 : index
    %c0_77 = arith.constant 0 : index
    %c0_78 = arith.constant 0 : index
    %178 = vector.load %arg3[%c1, %c0_77, %c0_78] : memref<2x1x32xf32, #tpu.memory_space<vmem>>, vector<1x1x32xf32>
    %179 = vector.shape_cast %178 : vector<1x1x32xf32> to vector<1x32xf32>
    %c1_79 = arith.constant 1 : index
    %c0_80 = arith.constant 0 : index
    %c0_81 = arith.constant 0 : index
    %180 = vector.load %arg4[%c1_79, %c0_80, %c0_81] : memref<2x1x32xf32, #tpu.memory_space<vmem>>, vector<1x1x32xf32>
    %181 = vector.shape_cast %180 : vector<1x1x32xf32> to vector<1x32xf32>
    %cst_82 = arith.constant dense<0.000000e+00> : vector<16xf32>
    %182 = vector.multi_reduction <add>, %177, %cst_82 [1] : vector<16x32xf32> to vector<16xf32>
    %183 = vector.shape_cast %182 : vector<16xf32> to vector<16x1xf32>
    %cst_83 = arith.constant 3.200000e+01 : f32
    %184 = vector.broadcast %cst_83 : f32 to vector<16x1xf32>
    %185 = arith.divf %183, %184 : vector<16x1xf32>
    %186 = vector.broadcast %185 : vector<16x1xf32> to vector<16x32xf32>
    %187 = arith.subf %177, %186 : vector<16x32xf32>
    %188 = arith.mulf %187, %187 : vector<16x32xf32>
    %cst_84 = arith.constant dense<0.000000e+00> : vector<16xf32>
    %189 = vector.multi_reduction <add>, %188, %cst_84 [1] : vector<16x32xf32> to vector<16xf32>
    %190 = vector.shape_cast %189 : vector<16xf32> to vector<16x1xf32>
    %cst_85 = arith.constant 3.200000e+01 : f32
    %191 = vector.broadcast %cst_85 : f32 to vector<16x1xf32>
    %192 = arith.divf %190, %191 : vector<16x1xf32>
    %193 = vector.broadcast %185 : vector<16x1xf32> to vector<16x32xf32>
    %194 = arith.subf %177, %193 : vector<16x32xf32>
    %cst_86 = arith.constant 9.99999974E-6 : f32
    %195 = vector.broadcast %cst_86 : f32 to vector<16x1xf32>
    %196 = arith.addf %192, %195 : vector<16x1xf32>
    %197 = math.rsqrt %196 : vector<16x1xf32>
    %198 = vector.broadcast %197 : vector<16x1xf32> to vector<16x32xf32>
    %199 = arith.mulf %194, %198 : vector<16x32xf32>
    %200 = vector.broadcast %179 : vector<1x32xf32> to vector<16x32xf32>
    %201 = arith.mulf %199, %200 : vector<16x32xf32>
    %202 = vector.broadcast %181 : vector<1x32xf32> to vector<16x32xf32>
    %203 = arith.addf %201, %202 : vector<16x32xf32>
    %c1_87 = arith.constant 1 : index
    %c0_88 = arith.constant 0 : index
    %c0_89 = arith.constant 0 : index
    %204 = vector.load %arg5[%c1_87, %c0_88, %c0_89] : memref<2x32x96xf32, #tpu.memory_space<vmem>>, vector<1x32x96xf32>
    %205 = vector.shape_cast %204 : vector<1x32x96xf32> to vector<32x96xf32>
    %cst_90 = arith.constant dense<0.000000e+00> : vector<16x96xf32>
    %206 = tpu.matmul %203, %205, %cst_90 {dimension_numbers = #tpu.dot_dimension_numbers<[1], [0], [0], [1], [0, 0, 1, 1], [], []>} : vector<16x32xf32>, vector<32x96xf32>, vector<16x96xf32> -> vector<16x96xf32>
    %c1_91 = arith.constant 1 : index
    %c0_92 = arith.constant 0 : index
    %c0_93 = arith.constant 0 : index
    %207 = vector.load %arg6[%c1_91, %c0_92, %c0_93] : memref<2x1x96xf32, #tpu.memory_space<vmem>>, vector<1x1x96xf32>
    %208 = vector.shape_cast %207 : vector<1x1x96xf32> to vector<1x96xf32>
    %209 = vector.broadcast %208 : vector<1x96xf32> to vector<16x96xf32>
    %210 = arith.addf %206, %209 : vector<16x96xf32>
    %211 = vector.shape_cast %210 : vector<16x96xf32> to vector<2x8x96xf32>
    %212 = vector.extract_strided_slice %211 {offsets = [0, 0, 0], sizes = [2, 8, 8], strides = [1, 1, 1]} : vector<2x8x96xf32> to vector<2x8x8xf32>
    %213 = vector.extract_strided_slice %211 {offsets = [0, 0, 32], sizes = [2, 8, 8], strides = [1, 1, 1]} : vector<2x8x96xf32> to vector<2x8x8xf32>
    %214 = vector.extract_strided_slice %211 {offsets = [0, 0, 64], sizes = [2, 8, 8], strides = [1, 1, 1]} : vector<2x8x96xf32> to vector<2x8x8xf32>
    "tpu.trace_start"() <{level = 10 : i32, message = "btd,bsd->bts"}> : () -> ()
    %cst_94 = arith.constant dense<0.000000e+00> : vector<2x8x8xf32>
    %215 = tpu.matmul %212, %213, %cst_94 {dimension_numbers = #tpu.dot_dimension_numbers<[2], [2], [1], [1], [0, 0, 0, 1, 1, 1], [0], [0]>} : vector<2x8x8xf32>, vector<2x8x8xf32>, vector<2x8x8xf32> -> vector<2x8x8xf32>
    "tpu.trace_stop"() : () -> ()
    %cst_95 = arith.constant 0.353553385 : f32
    %216 = vector.broadcast %cst_95 : f32 to vector<2x8x8xf32>
    %217 = arith.mulf %215, %216 : vector<2x8x8xf32>
    %cst_96 = arith.constant -1.000000e+30 : f32
    %218 = vector.shape_cast %4 : vector<1x8x8xi1> to vector<1x8x8xi1>
    %219 = vector.broadcast %218 : vector<1x8x8xi1> to vector<2x8x8xi1>
    %220 = vector.broadcast %cst_96 : f32 to vector<2x8x8xf32>
    %221 = arith.select %219, %217, %220 : vector<2x8x8xi1>, vector<2x8x8xf32>
    %cst_97 = arith.constant dense<0xFF800000> : vector<2x8xf32>
    %222 = vector.multi_reduction <maximumf>, %221, %cst_97 [2] : vector<2x8x8xf32> to vector<2x8xf32>
    %223 = vector.shape_cast %222 : vector<2x8xf32> to vector<2x8x1xf32>
    %224 = vector.broadcast %223 : vector<2x8x1xf32> to vector<2x8x8xf32>
    %225 = arith.subf %221, %224 : vector<2x8x8xf32>
    %226 = math.exp %225 : vector<2x8x8xf32>
    %cst_98 = arith.constant dense<0.000000e+00> : vector<2x8xf32>
    %227 = vector.multi_reduction <add>, %226, %cst_98 [2] : vector<2x8x8xf32> to vector<2x8xf32>
    %228 = vector.shape_cast %227 : vector<2x8xf32> to vector<2x8x1xf32>
    %229 = vector.broadcast %228 : vector<2x8x1xf32> to vector<2x8x8xf32>
    %230 = arith.divf %226, %229 : vector<2x8x8xf32>
    "tpu.trace_start"() <{level = 10 : i32, message = "bts,bsd->btd"}> : () -> ()
    %cst_99 = arith.constant dense<0.000000e+00> : vector<2x8x8xf32>
    %231 = tpu.matmul %230, %214, %cst_99 {dimension_numbers = #tpu.dot_dimension_numbers<[2], [1], [1], [2], [0, 0, 0, 1, 1, 2], [0], [0]>} : vector<2x8x8xf32>, vector<2x8x8xf32>, vector<2x8x8xf32> -> vector<2x8x8xf32>
    "tpu.trace_stop"() : () -> ()
    %232 = vector.extract_strided_slice %211 {offsets = [0, 0, 8], sizes = [2, 8, 8], strides = [1, 1, 1]} : vector<2x8x96xf32> to vector<2x8x8xf32>
    %233 = vector.extract_strided_slice %211 {offsets = [0, 0, 40], sizes = [2, 8, 8], strides = [1, 1, 1]} : vector<2x8x96xf32> to vector<2x8x8xf32>
    %234 = vector.extract_strided_slice %211 {offsets = [0, 0, 72], sizes = [2, 8, 8], strides = [1, 1, 1]} : vector<2x8x96xf32> to vector<2x8x8xf32>
    "tpu.trace_start"() <{level = 10 : i32, message = "btd,bsd->bts"}> : () -> ()
    %cst_100 = arith.constant dense<0.000000e+00> : vector<2x8x8xf32>
    %235 = tpu.matmul %232, %233, %cst_100 {dimension_numbers = #tpu.dot_dimension_numbers<[2], [2], [1], [1], [0, 0, 0, 1, 1, 1], [0], [0]>} : vector<2x8x8xf32>, vector<2x8x8xf32>, vector<2x8x8xf32> -> vector<2x8x8xf32>
    "tpu.trace_stop"() : () -> ()
    %cst_101 = arith.constant 0.353553385 : f32
    %236 = vector.broadcast %cst_101 : f32 to vector<2x8x8xf32>
    %237 = arith.mulf %235, %236 : vector<2x8x8xf32>
    %cst_102 = arith.constant -1.000000e+30 : f32
    %238 = vector.shape_cast %4 : vector<1x8x8xi1> to vector<1x8x8xi1>
    %239 = vector.broadcast %238 : vector<1x8x8xi1> to vector<2x8x8xi1>
    %240 = vector.broadcast %cst_102 : f32 to vector<2x8x8xf32>
    %241 = arith.select %239, %237, %240 : vector<2x8x8xi1>, vector<2x8x8xf32>
    %cst_103 = arith.constant dense<0xFF800000> : vector<2x8xf32>
    %242 = vector.multi_reduction <maximumf>, %241, %cst_103 [2] : vector<2x8x8xf32> to vector<2x8xf32>
    %243 = vector.shape_cast %242 : vector<2x8xf32> to vector<2x8x1xf32>
    %244 = vector.broadcast %243 : vector<2x8x1xf32> to vector<2x8x8xf32>
    %245 = arith.subf %241, %244 : vector<2x8x8xf32>
    %246 = math.exp %245 : vector<2x8x8xf32>
    %cst_104 = arith.constant dense<0.000000e+00> : vector<2x8xf32>
    %247 = vector.multi_reduction <add>, %246, %cst_104 [2] : vector<2x8x8xf32> to vector<2x8xf32>
    %248 = vector.shape_cast %247 : vector<2x8xf32> to vector<2x8x1xf32>
    %249 = vector.broadcast %248 : vector<2x8x1xf32> to vector<2x8x8xf32>
    %250 = arith.divf %246, %249 : vector<2x8x8xf32>
    "tpu.trace_start"() <{level = 10 : i32, message = "bts,bsd->btd"}> : () -> ()
    %cst_105 = arith.constant dense<0.000000e+00> : vector<2x8x8xf32>
    %251 = tpu.matmul %250, %234, %cst_105 {dimension_numbers = #tpu.dot_dimension_numbers<[2], [1], [1], [2], [0, 0, 0, 1, 1, 2], [0], [0]>} : vector<2x8x8xf32>, vector<2x8x8xf32>, vector<2x8x8xf32> -> vector<2x8x8xf32>
    "tpu.trace_stop"() : () -> ()
    %252 = vector.extract_strided_slice %211 {offsets = [0, 0, 16], sizes = [2, 8, 8], strides = [1, 1, 1]} : vector<2x8x96xf32> to vector<2x8x8xf32>
    %253 = vector.extract_strided_slice %211 {offsets = [0, 0, 48], sizes = [2, 8, 8], strides = [1, 1, 1]} : vector<2x8x96xf32> to vector<2x8x8xf32>
    %254 = vector.extract_strided_slice %211 {offsets = [0, 0, 80], sizes = [2, 8, 8], strides = [1, 1, 1]} : vector<2x8x96xf32> to vector<2x8x8xf32>
    "tpu.trace_start"() <{level = 10 : i32, message = "btd,bsd->bts"}> : () -> ()
    %cst_106 = arith.constant dense<0.000000e+00> : vector<2x8x8xf32>
    %255 = tpu.matmul %252, %253, %cst_106 {dimension_numbers = #tpu.dot_dimension_numbers<[2], [2], [1], [1], [0, 0, 0, 1, 1, 1], [0], [0]>} : vector<2x8x8xf32>, vector<2x8x8xf32>, vector<2x8x8xf32> -> vector<2x8x8xf32>
    "tpu.trace_stop"() : () -> ()
    %cst_107 = arith.constant 0.353553385 : f32
    %256 = vector.broadcast %cst_107 : f32 to vector<2x8x8xf32>
    %257 = arith.mulf %255, %256 : vector<2x8x8xf32>
    %cst_108 = arith.constant -1.000000e+30 : f32
    %258 = vector.shape_cast %4 : vector<1x8x8xi1> to vector<1x8x8xi1>
    %259 = vector.broadcast %258 : vector<1x8x8xi1> to vector<2x8x8xi1>
    %260 = vector.broadcast %cst_108 : f32 to vector<2x8x8xf32>
    %261 = arith.select %259, %257, %260 : vector<2x8x8xi1>, vector<2x8x8xf32>
    %cst_109 = arith.constant dense<0xFF800000> : vector<2x8xf32>
    %262 = vector.multi_reduction <maximumf>, %261, %cst_109 [2] : vector<2x8x8xf32> to vector<2x8xf32>
    %263 = vector.shape_cast %262 : vector<2x8xf32> to vector<2x8x1xf32>
    %264 = vector.broadcast %263 : vector<2x8x1xf32> to vector<2x8x8xf32>
    %265 = arith.subf %261, %264 : vector<2x8x8xf32>
    %266 = math.exp %265 : vector<2x8x8xf32>
    %cst_110 = arith.constant dense<0.000000e+00> : vector<2x8xf32>
    %267 = vector.multi_reduction <add>, %266, %cst_110 [2] : vector<2x8x8xf32> to vector<2x8xf32>
    %268 = vector.shape_cast %267 : vector<2x8xf32> to vector<2x8x1xf32>
    %269 = vector.broadcast %268 : vector<2x8x1xf32> to vector<2x8x8xf32>
    %270 = arith.divf %266, %269 : vector<2x8x8xf32>
    "tpu.trace_start"() <{level = 10 : i32, message = "bts,bsd->btd"}> : () -> ()
    %cst_111 = arith.constant dense<0.000000e+00> : vector<2x8x8xf32>
    %271 = tpu.matmul %270, %254, %cst_111 {dimension_numbers = #tpu.dot_dimension_numbers<[2], [1], [1], [2], [0, 0, 0, 1, 1, 2], [0], [0]>} : vector<2x8x8xf32>, vector<2x8x8xf32>, vector<2x8x8xf32> -> vector<2x8x8xf32>
    "tpu.trace_stop"() : () -> ()
    %272 = vector.extract_strided_slice %211 {offsets = [0, 0, 24], sizes = [2, 8, 8], strides = [1, 1, 1]} : vector<2x8x96xf32> to vector<2x8x8xf32>
    %273 = vector.extract_strided_slice %211 {offsets = [0, 0, 56], sizes = [2, 8, 8], strides = [1, 1, 1]} : vector<2x8x96xf32> to vector<2x8x8xf32>
    %274 = vector.extract_strided_slice %211 {offsets = [0, 0, 88], sizes = [2, 8, 8], strides = [1, 1, 1]} : vector<2x8x96xf32> to vector<2x8x8xf32>
    "tpu.trace_start"() <{level = 10 : i32, message = "btd,bsd->bts"}> : () -> ()
    %cst_112 = arith.constant dense<0.000000e+00> : vector<2x8x8xf32>
    %275 = tpu.matmul %272, %273, %cst_112 {dimension_numbers = #tpu.dot_dimension_numbers<[2], [2], [1], [1], [0, 0, 0, 1, 1, 1], [0], [0]>} : vector<2x8x8xf32>, vector<2x8x8xf32>, vector<2x8x8xf32> -> vector<2x8x8xf32>
    "tpu.trace_stop"() : () -> ()
    %cst_113 = arith.constant 0.353553385 : f32
    %276 = vector.broadcast %cst_113 : f32 to vector<2x8x8xf32>
    %277 = arith.mulf %275, %276 : vector<2x8x8xf32>
    %cst_114 = arith.constant -1.000000e+30 : f32
    %278 = vector.shape_cast %4 : vector<1x8x8xi1> to vector<1x8x8xi1>
    %279 = vector.broadcast %278 : vector<1x8x8xi1> to vector<2x8x8xi1>
    %280 = vector.broadcast %cst_114 : f32 to vector<2x8x8xf32>
    %281 = arith.select %279, %277, %280 : vector<2x8x8xi1>, vector<2x8x8xf32>
    %cst_115 = arith.constant dense<0xFF800000> : vector<2x8xf32>
    %282 = vector.multi_reduction <maximumf>, %281, %cst_115 [2] : vector<2x8x8xf32> to vector<2x8xf32>
    %283 = vector.shape_cast %282 : vector<2x8xf32> to vector<2x8x1xf32>
    %284 = vector.broadcast %283 : vector<2x8x1xf32> to vector<2x8x8xf32>
    %285 = arith.subf %281, %284 : vector<2x8x8xf32>
    %286 = math.exp %285 : vector<2x8x8xf32>
    %cst_116 = arith.constant dense<0.000000e+00> : vector<2x8xf32>
    %287 = vector.multi_reduction <add>, %286, %cst_116 [2] : vector<2x8x8xf32> to vector<2x8xf32>
    %288 = vector.shape_cast %287 : vector<2x8xf32> to vector<2x8x1xf32>
    %289 = vector.broadcast %288 : vector<2x8x1xf32> to vector<2x8x8xf32>
    %290 = arith.divf %286, %289 : vector<2x8x8xf32>
    "tpu.trace_start"() <{level = 10 : i32, message = "bts,bsd->btd"}> : () -> ()
    %cst_117 = arith.constant dense<0.000000e+00> : vector<2x8x8xf32>
    %291 = tpu.matmul %290, %274, %cst_117 {dimension_numbers = #tpu.dot_dimension_numbers<[2], [1], [1], [2], [0, 0, 0, 1, 1, 2], [0], [0]>} : vector<2x8x8xf32>, vector<2x8x8xf32>, vector<2x8x8xf32> -> vector<2x8x8xf32>
    "tpu.trace_stop"() : () -> ()
    %292 = tpu.concatenate %231, %251, %271, %291 in 2 : vector<2x8x8xf32>, vector<2x8x8xf32>, vector<2x8x8xf32>, vector<2x8x8xf32> -> vector<2x8x32xf32>
    %293 = vector.shape_cast %292 : vector<2x8x32xf32> to vector<16x32xf32>
    %c1_118 = arith.constant 1 : index
    %c0_119 = arith.constant 0 : index
    %c0_120 = arith.constant 0 : index
    %294 = vector.load %arg7[%c1_118, %c0_119, %c0_120] : memref<2x32x32xf32, #tpu.memory_space<vmem>>, vector<1x32x32xf32>
    %295 = vector.shape_cast %294 : vector<1x32x32xf32> to vector<32x32xf32>
    %cst_121 = arith.constant dense<0.000000e+00> : vector<16x32xf32>
    %296 = tpu.matmul %293, %295, %cst_121 {dimension_numbers = #tpu.dot_dimension_numbers<[1], [0], [0], [1], [0, 0, 1, 1], [], []>} : vector<16x32xf32>, vector<32x32xf32>, vector<16x32xf32> -> vector<16x32xf32>
    %c1_122 = arith.constant 1 : index
    %c0_123 = arith.constant 0 : index
    %c0_124 = arith.constant 0 : index
    %297 = vector.load %arg8[%c1_122, %c0_123, %c0_124] : memref<2x1x32xf32, #tpu.memory_space<vmem>>, vector<1x1x32xf32>
    %298 = vector.shape_cast %297 : vector<1x1x32xf32> to vector<1x32xf32>
    %299 = vector.broadcast %298 : vector<1x32xf32> to vector<16x32xf32>
    %300 = arith.addf %296, %299 : vector<16x32xf32>
    %301 = arith.addf %177, %300 : vector<16x32xf32>
    %c1_125 = arith.constant 1 : index
    %c0_126 = arith.constant 0 : index
    %c0_127 = arith.constant 0 : index
    %302 = vector.load %arg9[%c1_125, %c0_126, %c0_127] : memref<2x1x32xf32, #tpu.memory_space<vmem>>, vector<1x1x32xf32>
    %303 = vector.shape_cast %302 : vector<1x1x32xf32> to vector<1x32xf32>
    %c1_128 = arith.constant 1 : index
    %c0_129 = arith.constant 0 : index
    %c0_130 = arith.constant 0 : index
    %304 = vector.load %arg10[%c1_128, %c0_129, %c0_130] : memref<2x1x32xf32, #tpu.memory_space<vmem>>, vector<1x1x32xf32>
    %305 = vector.shape_cast %304 : vector<1x1x32xf32> to vector<1x32xf32>
    %cst_131 = arith.constant dense<0.000000e+00> : vector<16xf32>
    %306 = vector.multi_reduction <add>, %301, %cst_131 [1] : vector<16x32xf32> to vector<16xf32>
    %307 = vector.shape_cast %306 : vector<16xf32> to vector<16x1xf32>
    %cst_132 = arith.constant 3.200000e+01 : f32
    %308 = vector.broadcast %cst_132 : f32 to vector<16x1xf32>
    %309 = arith.divf %307, %308 : vector<16x1xf32>
    %310 = vector.broadcast %309 : vector<16x1xf32> to vector<16x32xf32>
    %311 = arith.subf %301, %310 : vector<16x32xf32>
    %312 = arith.mulf %311, %311 : vector<16x32xf32>
    %cst_133 = arith.constant dense<0.000000e+00> : vector<16xf32>
    %313 = vector.multi_reduction <add>, %312, %cst_133 [1] : vector<16x32xf32> to vector<16xf32>
    %314 = vector.shape_cast %313 : vector<16xf32> to vector<16x1xf32>
    %cst_134 = arith.constant 3.200000e+01 : f32
    %315 = vector.broadcast %cst_134 : f32 to vector<16x1xf32>
    %316 = arith.divf %314, %315 : vector<16x1xf32>
    %317 = vector.broadcast %309 : vector<16x1xf32> to vector<16x32xf32>
    %318 = arith.subf %301, %317 : vector<16x32xf32>
    %cst_135 = arith.constant 9.99999974E-6 : f32
    %319 = vector.broadcast %cst_135 : f32 to vector<16x1xf32>
    %320 = arith.addf %316, %319 : vector<16x1xf32>
    %321 = math.rsqrt %320 : vector<16x1xf32>
    %322 = vector.broadcast %321 : vector<16x1xf32> to vector<16x32xf32>
    %323 = arith.mulf %318, %322 : vector<16x32xf32>
    %324 = vector.broadcast %303 : vector<1x32xf32> to vector<16x32xf32>
    %325 = arith.mulf %323, %324 : vector<16x32xf32>
    %326 = vector.broadcast %305 : vector<1x32xf32> to vector<16x32xf32>
    %327 = arith.addf %325, %326 : vector<16x32xf32>
    %c1_136 = arith.constant 1 : index
    %c0_137 = arith.constant 0 : index
    %c0_138 = arith.constant 0 : index
    %328 = vector.load %arg11[%c1_136, %c0_137, %c0_138] : memref<2x32x128xf32, #tpu.memory_space<vmem>>, vector<1x32x128xf32>
    %329 = vector.shape_cast %328 : vector<1x32x128xf32> to vector<32x128xf32>
    %cst_139 = arith.constant dense<0.000000e+00> : vector<16x128xf32>
    %330 = tpu.matmul %327, %329, %cst_139 {dimension_numbers = #tpu.dot_dimension_numbers<[1], [0], [0], [1], [0, 0, 1, 1], [], []>} : vector<16x32xf32>, vector<32x128xf32>, vector<16x128xf32> -> vector<16x128xf32>
    %c1_140 = arith.constant 1 : index
    %c0_141 = arith.constant 0 : index
    %c0_142 = arith.constant 0 : index
    %331 = vector.load %arg12[%c1_140, %c0_141, %c0_142] : memref<2x1x128xf32, #tpu.memory_space<vmem>>, vector<1x1x128xf32>
    %332 = vector.shape_cast %331 : vector<1x1x128xf32> to vector<1x128xf32>
    %333 = vector.broadcast %332 : vector<1x128xf32> to vector<16x128xf32>
    %334 = arith.addf %330, %333 : vector<16x128xf32>
    %cst_143 = arith.constant 5.000000e-01 : f32
    %335 = vector.broadcast %cst_143 : f32 to vector<16x128xf32>
    %336 = arith.mulf %335, %334 : vector<16x128xf32>
    %cst_144 = arith.constant 0.707106769 : f32
    %337 = vector.broadcast %cst_144 : f32 to vector<16x128xf32>
    %338 = arith.mulf %334, %337 : vector<16x128xf32>
    %339 = math.erf %338 : vector<16x128xf32>
    %cst_145 = arith.constant 1.000000e+00 : f32
    %340 = vector.broadcast %cst_145 : f32 to vector<16x128xf32>
    %341 = arith.addf %340, %339 : vector<16x128xf32>
    %342 = arith.mulf %336, %341 : vector<16x128xf32>
    %c1_146 = arith.constant 1 : index
    %c0_147 = arith.constant 0 : index
    %c0_148 = arith.constant 0 : index
    %343 = vector.load %arg13[%c1_146, %c0_147, %c0_148] : memref<2x128x32xf32, #tpu.memory_space<vmem>>, vector<1x128x32xf32>
    %344 = vector.shape_cast %343 : vector<1x128x32xf32> to vector<128x32xf32>
    %cst_149 = arith.constant dense<0.000000e+00> : vector<16x32xf32>
    %345 = tpu.matmul %342, %344, %cst_149 {dimension_numbers = #tpu.dot_dimension_numbers<[1], [0], [0], [1], [0, 0, 1, 1], [], []>} : vector<16x128xf32>, vector<128x32xf32>, vector<16x32xf32> -> vector<16x32xf32>
    %c1_150 = arith.constant 1 : index
    %c0_151 = arith.constant 0 : index
    %c0_152 = arith.constant 0 : index
    %346 = vector.load %arg14[%c1_150, %c0_151, %c0_152] : memref<2x1x32xf32, #tpu.memory_space<vmem>>, vector<1x1x32xf32>
    %347 = vector.shape_cast %346 : vector<1x1x32xf32> to vector<1x32xf32>
    %348 = vector.broadcast %347 : vector<1x32xf32> to vector<16x32xf32>
    %349 = arith.addf %345, %348 : vector<16x32xf32>
    %350 = arith.addf %301, %349 : vector<16x32xf32>
    %c0_153 = arith.constant 0 : index
    %c0_154 = arith.constant 0 : index
    %351 = vector.load %arg15[%c0_153, %c0_154] : memref<1x32xf32, #tpu.memory_space<vmem>>, vector<1x32xf32>
    %c0_155 = arith.constant 0 : index
    %c0_156 = arith.constant 0 : index
    %352 = vector.load %arg16[%c0_155, %c0_156] : memref<1x32xf32, #tpu.memory_space<vmem>>, vector<1x32xf32>
    %cst_157 = arith.constant dense<0.000000e+00> : vector<16xf32>
    %353 = vector.multi_reduction <add>, %350, %cst_157 [1] : vector<16x32xf32> to vector<16xf32>
    %354 = vector.shape_cast %353 : vector<16xf32> to vector<16x1xf32>
    %cst_158 = arith.constant 3.200000e+01 : f32
    %355 = vector.broadcast %cst_158 : f32 to vector<16x1xf32>
    %356 = arith.divf %354, %355 : vector<16x1xf32>
    %357 = vector.broadcast %356 : vector<16x1xf32> to vector<16x32xf32>
    %358 = arith.subf %350, %357 : vector<16x32xf32>
    %359 = arith.mulf %358, %358 : vector<16x32xf32>
    %cst_159 = arith.constant dense<0.000000e+00> : vector<16xf32>
    %360 = vector.multi_reduction <add>, %359, %cst_159 [1] : vector<16x32xf32> to vector<16xf32>
    %361 = vector.shape_cast %360 : vector<16xf32> to vector<16x1xf32>
    %cst_160 = arith.constant 3.200000e+01 : f32
    %362 = vector.broadcast %cst_160 : f32 to vector<16x1xf32>
    %363 = arith.divf %361, %362 : vector<16x1xf32>
    %364 = vector.broadcast %356 : vector<16x1xf32> to vector<16x32xf32>
    %365 = arith.subf %350, %364 : vector<16x32xf32>
    %cst_161 = arith.constant 9.99999974E-6 : f32
    %366 = vector.broadcast %cst_161 : f32 to vector<16x1xf32>
    %367 = arith.addf %363, %366 : vector<16x1xf32>
    %368 = math.rsqrt %367 : vector<16x1xf32>
    %369 = vector.broadcast %368 : vector<16x1xf32> to vector<16x32xf32>
    %370 = arith.mulf %365, %369 : vector<16x32xf32>
    %371 = vector.broadcast %351 : vector<1x32xf32> to vector<16x32xf32>
    %372 = arith.mulf %370, %371 : vector<16x32xf32>
    %373 = vector.broadcast %352 : vector<1x32xf32> to vector<16x32xf32>
    %374 = arith.addf %372, %373 : vector<16x32xf32>
    %c0_162 = arith.constant 0 : index
    %c0_163 = arith.constant 0 : index
    %375 = vector.load %arg2[%c0_162, %c0_163] : memref<128x32xf32, #tpu.memory_space<vmem>>, vector<128x32xf32>
    %cst_164 = arith.constant dense<0.000000e+00> : vector<16x128xf32>
    %376 = tpu.matmul %374, %375, %cst_164 {dimension_numbers = #tpu.dot_dimension_numbers<[1], [1], [0], [0], [0, 0, 1, 0], [], []>} : vector<16x32xf32>, vector<128x32xf32>, vector<16x128xf32> -> vector<16x128xf32>
    %c0_165 = arith.constant 0 : index
    %c0_166 = arith.constant 0 : index
    %377 = vector.load %arg17[%c0_165, %c0_166] : memref<16x128xf32, #tpu.memory_space<vmem>>, vector<16x128xf32>
    tpu.vector_store %arg17[%c0_165, %c0_166], %376 {strides = array<i32>} : memref<16x128xf32, #tpu.memory_space<vmem>>, vector<16x128xf32>,
    return
  }
  func.func @transform_0(%arg0: i32) -> (i32, i32) {
    %c0_i32 = arith.constant 0 : i32
    %c0_i32_0 = arith.constant 0 : i32
    %c0_i32_1 = arith.constant 0 : i32
    return %c0_i32, %c0_i32_0 : i32, i32
  }
  func.func @transform_1(%arg0: i32) -> (i32, i32) {
    %c0_i32 = arith.constant 0 : i32
    %c0_i32_0 = arith.constant 0 : i32
    %c0_i32_1 = arith.constant 0 : i32
    return %c0_i32, %c0_i32_0 : i32, i32
  }
  func.func @transform_2(%arg0: i32) -> (i32, i32, i32) {
    %c0_i32 = arith.constant 0 : i32
    %c0_i32_0 = arith.constant 0 : i32
    %c0_i32_1 = arith.constant 0 : i32
    %c0_i32_2 = arith.constant 0 : i32
    return %c0_i32, %c0_i32_0, %c0_i32_1 : i32, i32, i32
  }
  func.func @transform_3(%arg0: i32) -> (i32, i32, i32) {
    %c0_i32 = arith.constant 0 : i32
    %c0_i32_0 = arith.constant 0 : i32
    %c0_i32_1 = arith.constant 0 : i32
    %c0_i32_2 = arith.constant 0 : i32
    return %c0_i32, %c0_i32_0, %c0_i32_1 : i32, i32, i32
  }
  func.func @transform_4(%arg0: i32) -> (i32, i32, i32) {
    %c0_i32 = arith.constant 0 : i32
    %c0_i32_0 = arith.constant 0 : i32
    %c0_i32_1 = arith.constant 0 : i32
    %c0_i32_2 = arith.constant 0 : i32
    return %c0_i32, %c0_i32_0, %c0_i32_1 : i32, i32, i32
  }
  func.func @transform_5(%arg0: i32) -> (i32, i32, i32) {
    %c0_i32 = arith.constant 0 : i32
    %c0_i32_0 = arith.constant 0 : i32
    %c0_i32_1 = arith.constant 0 : i32
    %c0_i32_2 = arith.constant 0 : i32
    return %c0_i32, %c0_i32_0, %c0_i32_1 : i32, i32, i32
  }
  func.func @transform_6(%arg0: i32) -> (i32, i32, i32) {
    %c0_i32 = arith.constant 0 : i32
    %c0_i32_0 = arith.constant 0 : i32
    %c0_i32_1 = arith.constant 0 : i32
    %c0_i32_2 = arith.constant 0 : i32
    return %c0_i32, %c0_i32_0, %c0_i32_1 : i32, i32, i32
  }
  func.func @transform_7(%arg0: i32) -> (i32, i32, i32) {
    %c0_i32 = arith.constant 0 : i32
    %c0_i32_0 = arith.constant 0 : i32
    %c0_i32_1 = arith.constant 0 : i32
    %c0_i32_2 = arith.constant 0 : i32
    return %c0_i32, %c0_i32_0, %c0_i32_1 : i32, i32, i32
  }
  func.func @transform_8(%arg0: i32) -> (i32, i32, i32) {
    %c0_i32 = arith.constant 0 : i32
    %c0_i32_0 = arith.constant 0 : i32
    %c0_i32_1 = arith.constant 0 : i32
    %c0_i32_2 = arith.constant 0 : i32
    return %c0_i32, %c0_i32_0, %c0_i32_1 : i32, i32, i32
  }
  func.func @transform_9(%arg0: i32) -> (i32, i32, i32) {
    %c0_i32 = arith.constant 0 : i32
    %c0_i32_0 = arith.constant 0 : i32
    %c0_i32_1 = arith.constant 0 : i32
    %c0_i32_2 = arith.constant 0 : i32
    return %c0_i32, %c0_i32_0, %c0_i32_1 : i32, i32, i32
  }
  func.func @transform_10(%arg0: i32) -> (i32, i32, i32) {
    %c0_i32 = arith.constant 0 : i32
    %c0_i32_0 = arith.constant 0 : i32
    %c0_i32_1 = arith.constant 0 : i32
    %c0_i32_2 = arith.constant 0 : i32
    return %c0_i32, %c0_i32_0, %c0_i32_1 : i32, i32, i32
  }
  func.func @transform_11(%arg0: i32) -> (i32, i32, i32) {
    %c0_i32 = arith.constant 0 : i32
    %c0_i32_0 = arith.constant 0 : i32
    %c0_i32_1 = arith.constant 0 : i32
    %c0_i32_2 = arith.constant 0 : i32
    return %c0_i32, %c0_i32_0, %c0_i32_1 : i32, i32, i32
  }
  func.func @transform_12(%arg0: i32) -> (i32, i32, i32) {
    %c0_i32 = arith.constant 0 : i32
    %c0_i32_0 = arith.constant 0 : i32
    %c0_i32_1 = arith.constant 0 : i32
    %c0_i32_2 = arith.constant 0 : i32
    return %c0_i32, %c0_i32_0, %c0_i32_1 : i32, i32, i32
  }
  func.func @transform_13(%arg0: i32) -> (i32, i32, i32) {
    %c0_i32 = arith.constant 0 : i32
    %c0_i32_0 = arith.constant 0 : i32
    %c0_i32_1 = arith.constant 0 : i32
    %c0_i32_2 = arith.constant 0 : i32
    return %c0_i32, %c0_i32_0, %c0_i32_1 : i32, i32, i32
  }
  func.func @transform_14(%arg0: i32) -> (i32, i32) {
    %c0_i32 = arith.constant 0 : i32
    %c0_i32_0 = arith.constant 0 : i32
    %c0_i32_1 = arith.constant 0 : i32
    return %c0_i32, %c0_i32_0 : i32, i32
  }
  func.func @transform_15(%arg0: i32) -> (i32, i32) {
    %c0_i32 = arith.constant 0 : i32
    %c0_i32_0 = arith.constant 0 : i32
    %c0_i32_1 = arith.constant 0 : i32
    return %c0_i32, %c0_i32_0 : i32, i32
  }
  func.func @transform_16(%arg0: i32) -> (i32, i32) {
    %c0_i32 = arith.constant 0 : i32
    %c0_i32_0 = arith.constant 0 : i32
    %c0_i32_1 = arith.constant 0 : i32
    return %c0_i32, %c0_i32_0 : i32, i32
  }
}

</mosaic_0001>

<bundles_post_ra>
// kernel: _gpt_forward_impl.1
= control target key start
LH: loop header
LB: loop body
LE: loop exit
PB: predicated region body
PF: predicated region fallthrough
CT: control target
= control target key end

     0   :  { %s5742_s0 = inlined_call_operand.vmem [shape: f32[16,32], index: 0, kind: input, shape index: {}]   ;;  %s5743_s1 = inlined_call_operand.vmem [shape: f32[128,32], index: 1, kind: input, shape index: {}]   ;;  %s5744_s2 = inlined_call_operand.vmem [shape: f32[2,1,32], index: 2, kind: input, shape index: {}]   ;;  %s5745_s3 = inlined_call_operand.vmem [shape: f32[2,1,32], index: 3, kind: input, shape index: {}]   ;;  %s5746_s4 = inlined_call_operand.vmem [shape: f32[2,32,96], index: 4, kind: input, shape index: {}]   ;;  %s5747_s5 = inlined_call_operand.vmem [shape: f32[2,1,96], index: 5, kind: input, shape index: {}]   ;;  %s5748_s6 = inlined_call_operand.vmem [shape: f32[2,32,32], index: 6, kind: input, shape index: {}]   ;;  %s5749_s7 = inlined_call_operand.vmem [shape: f32[2,1,32], index: 7, kind: input, shape index: {}]   ;;  %s5750_s8 = inlined_call_operand.vmem [shape: f32[2,1,32], index: 8, kind: input, shape index: {}]   ;;  %s5751_s9 = inlined_call_operand.vmem [shape: f32[2,1,32], index: 9, kind: input, shape index: {}]   ;;  %s5752_s10 = inlined_call_operand.vmem [shape: f32[2,32,128], index: 10, kind: input, shape index: {}]   ;;  %s5753_s11 = inlined_call_operand.vmem [shape: f32[2,1,128], index: 11, kind: input, shape index: {}]   ;;  %s5754_s12 = inlined_call_operand.vmem [shape: f32[2,128,32], index: 12, kind: input, shape index: {}]   ;;  %s5755_s13 = inlined_call_operand.vmem [shape: f32[2,1,32], index: 13, kind: input, shape index: {}]   ;;  %s5756_s14 = inlined_call_operand.vmem [shape: f32[1,32], index: 14, kind: input, shape index: {}]   ;;  %s5757_s15 = inlined_call_operand.vmem [shape: f32[1,32], index: 15, kind: input, shape index: {}]   ;;  %s5758_s16 = inlined_call_operand.hbm [shape: f32[16,128], index: 16, kind: output, shape index: {}]  }
   0x1   :  { %5774 = sst [smem:[#allocation5_spill]] %s5742_s0 }
   0x2   :  { %s5775_s23 = sld [smem:[#allocation5_spill]]  ;;  %vm63_vm0 = vcmask 261120  }
   0x8   :  { %v4984_v0 = vld [vmem:[%s5775_s23] sm:$0xff]  ;;  %v4989_v1 = vld [vmem:[%s5775_s23 + $0x8] sm:$0xff] }
   0x9   :  { %21 = vsyncpa [#allocation3], 0  ;;  %v64_v2 = vsel %vm63_vm0, %v4984_v0, 0.0  ;;  %v67_v3 = vsel %vm63_vm0, %v4989_v1, 0.0  ;;  %v107_v14 = vld [vmem:[%s5746_s4] sm:$0xff]  ;;  %v108_v15 = vld [vmem:[%s5746_s4 + $0x8] sm:$0xff]  ;;  %v56_v44 = vlaneseq }
   0xa   :  { %65 = vadd.xlane.f32.xlu0 %v64_v2  ;;  %v109_v16 = vld [vmem:[%s5746_s4 + $0x10] sm:$0xff]  ;;  %v4584_v17 = vpack.c.bf16 %v108_v15, %v107_v14  ;;  %v110_v18 = vld [vmem:[%s5746_s4 + $0x18] sm:$0xff]  ;;  %v3967_v27 = vld [vmem:[%s5744_s2] ss:$0 sm:$0xff]  ;;  %v4878_v36 = vmov 0.0   ;;  %vm4879_vm1 = vmmov 0  }
   0xb   :  { %v4588_v19 = vpack.c.bf16 %v110_v18, %v109_v16  ;;  %v3968_v29 = vld [vmem:[%s5745_s3] ss:$0 sm:$0xff]  ;;  %4264 = vmatprep.subr.mxu1 %v4878_v36  ;;  %4266 = vmatprep.mubr.msk.f32.mxu1 %vm4879_vm1, %v4878_v36  ;;  %s4880_s25 = smov 96   ;;  %vm202_vm2 = vcmask 64512   ;;  %v57_v45 = vshrl.u32 %v56_v44, 7  ;;  %v59_v46 = vand.u32 127, %v56_v44  ;;  %vm5641_vm6 = vmpackc.low %vm63_vm0, %vm63_vm0 }
   0xc   :  { %4585 = vmatprep.subr.bf16.mxu0 %v4584_v17  ;;  %v3969_v37 = vld [vmem:[%s5747_s5] ss:$0 sm:$0xff]  ;;  %s4881_s26 = smov 64   ;;  %s4882_s27 = smov 88   ;;  %vm1565_vm4 = vcmask 195584   ;;  %vm1562_vm5 = vcmask 130048  }
   0xd   :  { %4587 = vmatpush3.bf16.msra.mxu0 %v4584_v17  ;;  %vm5048_vm3 = vcmp.ge.s32.totalorder %v57_v45, %v59_v46  ;;  %s4883_s28 = smov 120   ;;  %s4884_s29 = smov 56  }
   0xe   :  { %68 = vadd.xlane.f32.xlu0 %v67_v3  ;;  %4589 = vmatprep.subr.bf16.mxu0 %v4588_v19  ;;  %s4885_s30 = smov 80   ;;  %s4886_s0 = smov 112  }
   0xf   :  { %s5770_s17 = smov 48   ;;  %s5768_s18 = smov 72  }
  0x10   :  { %s5766_s19 = smov 104   ;;  %s5764_s20 = smov 40  }
  0x11   :  { %4591 = vmatpush3.bf16.msra.mxu0 %v4588_v19  ;;  %s5762_s21 = smov 8   ;;  %s5760_s22 = smov 16  }
  0x12   :  { %4274 = vmatprep.subr.mxu0 %v4878_v36  ;;  %s5772_s23 = smov 24  }
  0x97   :  { %v66_v4 = vpop.xlane.xlu0 %65 }
  0x98   :  { %v71_v5 = vmul.f32 0.03125, %v66_v4 }
  0x9a   :  { %v73_v6 = vsub.f32 %v4984_v0, %v71_v5 }
  0x9b   :  { %v69_v7 = vpop.xlane.xlu0 %68 }
  0x9c   :  { %v72_v8 = vmul.f32 0.03125, %v69_v7  ;;  %v75_v9 = vmul.f32 %v73_v6, %v73_v6 }
  0x9e   :  { %v74_v10 = vsub.f32 %v4989_v1, %v72_v8  ;;  %v77_v11 = vsel %vm63_vm0, %v75_v9, 0.0 }
  0x9f   :  { %78 = vadd.xlane.f32.xlu1 %v77_v11 }
  0xa0   :  { %v76_v12 = vmul.f32 %v74_v10, %v74_v10 }
  0xa2   :  { %v80_v13 = vsel %vm63_vm0, %v76_v12, 0.0 }
  0xa3   :  { %81 = vadd.xlane.f32.xlu1 %v80_v13 }
 0x12c   :  { %v79_v20 = vpop.xlane.xlu1 %78 }
 0x12d   :  { %v83_v21 = vmul.f32 0.03125, %v79_v20 }
 0x12f   :  { %v85_v22 = vadd.f32 1e-05, %v83_v21 }
 0x130   :  { %v82_v23 = vpop.xlane.xlu1 %81 }
 0x131   :  { %4762 = vrsqrt.f32 %v85_v22  ;;  %v84_v24 = vmul.f32 0.03125, %v82_v23 }
 0x133   :  { %v86_v25 = vadd.f32 1e-05, %v84_v24 }
 0x135   :  { %4764 = vrsqrt.f32 %v86_v25 }
 0x13b   :  { %v4763_v26 = vpop.eup %4762 }
 0x13c   :  { %v89_v28 = vmul.f32 %v4763_v26, %v73_v6 }
 0x13e   :  { %v97_v30 = vmul.f32 %v3967_v27, %v89_v28 }
 0x13f   :  { %v4765_v31 = vpop.eup %4764 }
 0x140   :  { %v90_v32 = vmul.f32 %v4765_v31, %v74_v10  ;;  %v105_v33 = vadd.f32 %v3968_v29, %v97_v30 }
 0x142   :  { %v98_v34 = vmul.f32 %v3967_v27, %v90_v32  ;;  %4261 = vmatprep.mubr.msk.f32.mxu0 %vm63_vm0, %v105_v33 }
 0x144   :  { %v106_v35 = vadd.f32 %v3968_v29, %v98_v34 }
 0x146   :  { %4262 = vmatmul.mubr.msk.f32.vlgmr.msra.gmra.mrb[0].mxu0 %vm63_vm0, %v106_v35 }
 0x147   :  { %4276 = vmatprep.mubr.msk.f32.mxu0 %vm4879_vm1, %v4878_v36 }
 0x219   :  { %v4263_v38 = vpop.f32.mrb[0].mxu0 }
 0x21a   :  { %v5028_v39 = vadd.f32 %v4263_v38, %v3969_v37  ;;  %v190_v40 = vpop.f32.mrb[1].mxu0 }
 0x21b   :  { %v5030_v41 = vadd.f32 %v3969_v37, %v190_v40 }
 0x21c   :  { %278 = vrot.lane.b32.xlu1 %v5028_v39, %s4880_s25 }
 0x21d   :  { %200 = vrot.lane.b32.xlu0 %v5030_v41, %s4880_s25 }
 0x28e   :  { %v279_v43 = vpop.permute.xlu1 %278 }
 0x28f   :  { %v201_v42 = vpop.permute.xlu0 %200 }
 0x290   :  { %4265 = vmatpush3.xpose.msk.msra.mxu1 %vm202_vm2, %v201_v42 }
 0x291   :  { %4269 = vmatprep.subr.mxu1 %v4878_v36 }
 0x293   :  { %4267 = vmatmul.mubr.msk.f32.vlgmr.msra.gmra.mrb[0].mxu1 %vm202_vm2, %v5030_v41 }
 0x294   :  { %4270 = vmatpush3.xpose.msk.msra.mxu1 %vm202_vm2, %v279_v43  ;;  %4271 = vmatprep.mubr.msk.f32.mxu1 %vm4879_vm1, %v4878_v36 }
 0x295   :  { %4279 = vmatprep.subr.mxu1 %v4878_v36 }
 0x297   :  { %4272 = vmatmul.mubr.msk.f32.vlgmr.msra.gmra.mrb[2].mxu1 %vm202_vm2, %v5028_v39 }
 0x298   :  { %4281 = vmatprep.mubr.msk.f32.mxu1 %vm4879_vm1, %v4878_v36 }
 0x366   :  { %v273_v47 = vpop.f32.mrb[0].mxu1 }
 0x367   :  { %v354_v49 = vmul.f32 0.35355338, %v273_v47  ;;  %v4268_v50 = vpop.f32.mrb[1].mxu1 }
 0x369   :  { %v358_v51 = vsel %vm5048_vm3, %v354_v49, -1e+30 }
 0x36a   :  { %v350_v52 = vpop.f32.mrb[2].mxu1  ;;  %v360_v53 = vsel %vm202_vm2, %v358_v51, -inf }
 0x36b   :  { %v355_v54 = vmul.f32 0.35355338, %v350_v52  ;;  %361 = vmax.xlane.f32.xlu1 %v360_v53  ;;  %v4273_v55 = vpop.f32.mrb[3].mxu1 }
 0x36d   :  { %v359_v56 = vsel %vm5048_vm3, %v355_v54, -1e+30 }
 0x36e   :  { %v363_v57 = vsel %vm202_vm2, %v359_v56, -inf }
 0x36f   :  { %364 = vmax.xlane.f32.xlu0 %v363_v57 }
 0x37c   :  { %458 = vrot.lane.b32.xlu1 %v5028_v39, %s4881_s26 }
 0x380   :  { %536 = vrot.lane.b32.xlu1 %v5030_v41, %s4882_s27 }
 0x384   :  { %614 = vrot.lane.b32.xlu1 %v5028_v39, %s4882_s27 }
 0x385   :  { %382 = vrot.lane.b32.xlu0 %v5030_v41, %s4881_s26 }
 0x3f8   :  { %v362_v58 = vpop.xlane.xlu1 %361 }
 0x3f9   :  { %v366_v59 = vsub.f32 %v358_v51, %v362_v58 }
 0x3fb   :  { %v368_v60 = vmul.f32 1.442695, %v366_v59 }
 0x3fc   :  { %v459_v61 = vpop.permute.xlu1 %458  ;;  %v365_v62 = vpop.xlane.xlu0 %364 }
 0x3fd   :  { %4766 = vpow2.f32 %v368_v60  ;;  %v367_v63 = vsub.f32 %v359_v56, %v365_v62  ;;  %4280 = vmatpush3.msra.mxu1 %v459_v61 }
 0x3fe   :  { %4289 = vmatprep.subr.mxu1 %v4878_v36 }
 0x3ff   :  { %v370_v2 = vmul.f32 1.442695, %v367_v63 }
 0x400   :  { %v383_v3 = vpop.permute.xlu0 %382  ;;  %v537_v8 = vpop.permute.xlu1 %536 }
 0x401   :  { %4768 = vpow2.f32 %v370_v2  ;;  %4275 = vmatpush3.msra.mxu0 %v383_v3 }
 0x402   :  { %4284 = vmatprep.subr.mxu0 %v4878_v36 }
 0x404   :  { %v615_v9 = vpop.permute.xlu1 %614 }
 0x407   :  { %v4767_v4 = vpop.eup %4766 }
 0x408   :  { %v372_v5 = vsel %vm202_vm2, %v4767_v4, 0.0 }
 0x409   :  { %373 = vadd.xlane.f32.xlu0 %v372_v5 }
 0x40b   :  { %v4769_v6 = vpop.eup %4768 }
 0x40c   :  { %v375_v7 = vsel %vm202_vm2, %v4769_v6, 0.0 }
 0x40d   :  { %376 = vadd.xlane.f32.xlu1 %v375_v7 }
 0x41e   :  { %612 = vrot.lane.b32.xlu1 %v5028_v39, %s4883_s28 }
 0x41f   :  { %534 = vrot.lane.b32.xlu0 %v5030_v41, %s4883_s28 }
 0x496   :  { %v374_v10 = vpop.xlane.xlu0 %373 }
 0x497   :  { %4770 = vrcp.f32 %v374_v10 }
 0x49a   :  { %v377_v11 = vpop.xlane.xlu1 %376  ;;  %v535_v16 = vpop.permute.xlu0 %534 }
 0x49b   :  { %4772 = vrcp.f32 %v377_v11 }
 0x49e   :  { %v613_v17 = vpop.permute.xlu1 %612 }
 0x4a1   :  { %v4771_v12 = vpop.eup %4770 }
 0x4a2   :  { %v379_v13 = vmul.f32 %v4771_v12, %v4767_v4 }
 0x4a4   :  { %4277 = vmatmul.mubr.msk.f32.vlgmr.msra.gmra.mrb[2].mxu0 %vm202_vm2, %v379_v13 }
 0x4a5   :  { %v4773_v14 = vpop.eup %4772  ;;  %4285 = vmatpush3.xpose.msk.msra.mxu0 %vm202_vm2, %v537_v8  ;;  %4286 = vmatprep.mubr.msk.f32.mxu0 %vm4879_vm1, %v4878_v36 }
 0x4a6   :  { %v381_v15 = vmul.f32 %v4773_v14, %v4769_v6  ;;  %4294 = vmatprep.subr.mxu0 %v4878_v36 }
 0x4a8   :  { %4282 = vmatmul.mubr.msk.f32.vlgmr.msra.gmra.mrb[4].mxu1 %vm202_vm2, %v381_v15  ;;  %4287 = vmatmul.mubr.msk.f32.vlgmr.msra.gmra.mrb[4].mxu0 %vm202_vm2, %v535_v16 }
 0x4a9   :  { %4290 = vmatpush3.xpose.msk.msra.mxu1 %vm202_vm2, %v615_v9  ;;  %4291 = vmatprep.mubr.msk.f32.mxu1 %vm4879_vm1, %v4878_v36 }
 0x4aa   :  { %4299 = vmatprep.subr.mxu1 %v4878_v36  ;;  %4296 = vmatprep.mubr.msk.f32.mxu0 %vm4879_vm1, %v4878_v36 }
 0x4ac   :  { %4292 = vmatmul.mubr.msk.f32.vlgmr.msra.gmra.mrb[6].mxu1 %vm202_vm2, %v613_v17 }
 0x4ad   :  { %4301 = vmatprep.mubr.msk.f32.mxu1 %vm4879_vm1, %v4878_v36 }
 0x577   :  { %v5090_v18 = vpop.f32.mrb[2].mxu0 }
 0x578   :  { %v4278_v19 = vpop.f32.mrb[3].mxu0 }
 0x57b   :  { %v5092_v20 = vpop.f32.mrb[4].mxu1  ;;  %v608_v21 = vpop.f32.mrb[4].mxu0 }
 0x57c   :  { %v690_v22 = vmul.f32 0.35355338, %v608_v21  ;;  %v4283_v23 = vpop.f32.mrb[5].mxu1  ;;  %v4288_v24 = vpop.f32.mrb[5].mxu0 }
 0x57e   :  { %v692_v25 = vsel %vm5048_vm3, %v690_v22, -1e+30 }
 0x57f   :  { %v686_v26 = vpop.f32.mrb[6].mxu1  ;;  %v694_v27 = vsel %vm202_vm2, %v692_v25, -inf }
 0x580   :  { %v691_v28 = vmul.f32 0.35355338, %v686_v26  ;;  %695 = vmax.xlane.f32.xlu0 %v694_v27  ;;  %v4293_v29 = vpop.f32.mrb[7].mxu1 }
 0x582   :  { %v693_v30 = vsel %vm5048_vm3, %v691_v28, -1e+30 }
 0x583   :  { %v697_v31 = vsel %vm202_vm2, %v693_v30, -inf }
 0x584   :  { %698 = vmax.xlane.f32.xlu1 %v697_v31 }
 0x595   :  { %792 = vrot.lane.b32.xlu1 %v5028_v39, %s4884_s29 }
 0x596   :  { %716 = vrot.lane.b32.xlu0 %v5030_v41, %s4884_s29 }
 0x599   :  { %870 = vrot.lane.b32.xlu1 %v5030_v41, %s4885_s30 }
 0x59d   :  { %948 = vrot.lane.b32.xlu1 %v5028_v39, %s4885_s30 }
 0x5a1   :  { %946 = vrot.lane.b32.xlu1 %v5028_v39, %s4886_s0 }
 0x60d   :  { %v696_v32 = vpop.xlane.xlu0 %695 }
 0x60e   :  { %v700_v33 = vsub.f32 %v692_v25, %v696_v32 }
 0x610   :  { %v702_v34 = vmul.f32 1.442695, %v700_v33 }
 0x611   :  { %v717_v35 = vpop.permute.xlu0 %716  ;;  %v699_v37 = vpop.xlane.xlu1 %698 }
 0x612   :  { %4774 = vpow2.f32 %v702_v34  ;;  %v701_v38 = vsub.f32 %v693_v30, %v699_v37  ;;  %4295 = vmatpush3.msra.mxu0 %v717_v35 }
 0x613   :  { %4304 = vmatprep.subr.mxu0 %v4878_v36 }
 0x614   :  { %v704_v40 = vmul.f32 1.442695, %v701_v38 }
 0x615   :  { %v793_v42 = vpop.permute.xlu1 %792 }
 0x616   :  { %4776 = vpow2.f32 %v704_v40  ;;  %4300 = vmatpush3.msra.mxu1 %v793_v42 }
 0x617   :  { %4309 = vmatprep.subr.mxu1 %v4878_v36 }
 0x619   :  { %v871_v50 = vpop.permute.xlu1 %870 }
 0x61c   :  { %v4775_v43 = vpop.eup %4774 }
 0x61d   :  { %v706_v44 = vsel %vm202_vm2, %v4775_v43, 0.0  ;;  %v949_v54 = vpop.permute.xlu1 %948 }
 0x61e   :  { %707 = vadd.xlane.f32.xlu0 %v706_v44 }
 0x620   :  { %v4777_v45 = vpop.eup %4776 }
 0x621   :  { %v709_v46 = vsel %vm202_vm2, %v4777_v45, 0.0  ;;  %v947_v57 = vpop.permute.xlu1 %946 }
 0x622   :  { %710 = vadd.xlane.f32.xlu0 %v709_v46 }
 0x638   :  { %868 = vrot.lane.b32.xlu0 %v5030_v41, %s4886_s0 }
 0x6ab   :  { %v708_v47 = vpop.xlane.xlu0 %707 }
 0x6ac   :  { %4778 = vrcp.f32 %v708_v47 }
 0x6af   :  { %v711_v49 = vpop.xlane.xlu0 %710 }
 0x6b0   :  { %4780 = vrcp.f32 %v711_v49 }
 0x6b3   :  { %v869_v56 = vpop.permute.xlu0 %868 }
 0x6b6   :  { %v4779_v51 = vpop.eup %4778 }
 0x6b7   :  { %v713_v52 = vmul.f32 %v4779_v51, %v4775_v43 }
 0x6b9   :  { %4297 = vmatmul.mubr.msk.f32.vlgmr.msra.gmra.mrb[6].mxu0 %vm202_vm2, %v713_v52 }
 0x6ba   :  { %v4781_v53 = vpop.eup %4780  ;;  %4305 = vmatpush3.xpose.msk.msra.mxu0 %vm202_vm2, %v871_v50  ;;  %4306 = vmatprep.mubr.msk.f32.mxu0 %vm4879_vm1, %v4878_v36 }
 0x6bb   :  { %v715_v55 = vmul.f32 %v4781_v53, %v4777_v45  ;;  %4314 = vmatprep.subr.mxu0 %v4878_v36 }
 0x6bd   :  { %4302 = vmatmul.mubr.msk.f32.vlgmr.msra.gmra.mrb[8].mxu1 %vm202_vm2, %v715_v55  ;;  %4307 = vmatmul.mubr.msk.f32.vlgmr.msra.gmra.mrb[8].mxu0 %vm202_vm2, %v869_v56 }
 0x6be   :  { %4310 = vmatpush3.xpose.msk.msra.mxu1 %vm202_vm2, %v949_v54  ;;  %4311 = vmatprep.mubr.msk.f32.mxu1 %vm4879_vm1, %v4878_v36 }
 0x6bf   :  { %4319 = vmatprep.subr.mxu1 %v4878_v36  ;;  %4316 = vmatprep.mubr.msk.f32.mxu0 %vm4879_vm1, %v4878_v36 }
 0x6c1   :  { %4312 = vmatmul.mubr.msk.f32.vlgmr.msra.gmra.mrb[10].mxu1 %vm202_vm2, %v947_v57 }
 0x6c2   :  { %4321 = vmatprep.mubr.msk.f32.mxu1 %vm4879_vm1, %v4878_v36 }
 0x78c   :  { %v5132_v58 = vpop.f32.mrb[6].mxu0 }
 0x78d   :  { %v4298_v59 = vpop.f32.mrb[7].mxu0 }
 0x790   :  { %v5134_v60 = vpop.f32.mrb[8].mxu1  ;;  %v942_v61 = vpop.f32.mrb[8].mxu0 }
 0x791   :  { %v1024_v62 = vmul.f32 0.35355338, %v942_v61  ;;  %v4303_v63 = vpop.f32.mrb[9].mxu1  ;;  %v4308_v2 = vpop.f32.mrb[9].mxu0 }
 0x793   :  { %v1026_v3 = vsel %vm5048_vm3, %v1024_v62, -1e+30 }
 0x794   :  { %v1020_v4 = vpop.f32.mrb[10].mxu1  ;;  %v1028_v5 = vsel %vm202_vm2, %v1026_v3, -inf }
 0x795   :  { %v1025_v6 = vmul.f32 0.35355338, %v1020_v4  ;;  %1029 = vmax.xlane.f32.xlu0 %v1028_v5  ;;  %v4313_v7 = vpop.f32.mrb[11].mxu1 }
 0x796   :  { %v1569_v7 = vld [vmem:[%s5748_s6 + $0x8] sm:$0xff] }
 0x797   :  { %v1027_v8 = vsel %vm5048_vm3, %v1025_v6, -1e+30 }
 0x798   :  { %v1031_v9 = vsel %vm202_vm2, %v1027_v8, -inf }
 0x799   :  { %1032 = vmax.xlane.f32.xlu1 %v1031_v9  ;;  %v1570_v9 = vld [vmem:[%s5748_s6 + $0x10] sm:$0xff] }
 0x7aa   :  { %1126 = vrot.lane.b32.xlu1 %v5028_v39, %s5770_s17 }
 0x7ab   :  { %1050 = vrot.lane.b32.xlu0 %v5030_v41, %s5770_s17 }
 0x7ae   :  { %1204 = vrot.lane.b32.xlu1 %v5030_v41, %s5768_s18 }
 0x7b2   :  { %1282 = vrot.lane.b32.xlu1 %v5028_v39, %s5768_s18 }
 0x7b6   :  { %1280 = vrot.lane.b32.xlu1 %v5028_v39, %s5766_s19 }
 0x822   :  { %v1030_v10 = vpop.xlane.xlu0 %1029 }
 0x823   :  { %v1034_v11 = vsub.f32 %v1026_v3, %v1030_v10  ;;  %v1571_v10 = vld [vmem:[%s5748_s6 + $0x18] sm:$0xff] }
 0x825   :  { %v1036_v12 = vmul.f32 1.442695, %v1034_v11  ;;  %v4596_v11 = vpack.c.bf16 %v1571_v10, %v1570_v9  ;;  %v1811_v9 = vld [vmem:[%s5754_s12 + $0x18] sm:$0xff] }
 0x826   :  { %v1051_v13 = vpop.permute.xlu0 %1050  ;;  %v1033_v14 = vpop.xlane.xlu1 %1032 }
 0x827   :  { %4782 = vpow2.f32 %v1036_v12  ;;  %v1035_v15 = vsub.f32 %v1027_v8, %v1033_v14  ;;  %4315 = vmatpush3.msra.mxu0 %v1051_v13 }
 0x828   :  { %4324 = vmatprep.subr.mxu0 %v4878_v36 }
 0x829   :  { %v1038_v16 = vmul.f32 1.442695, %v1035_v15 }
 0x82a   :  { %v1127_v17 = vpop.permute.xlu1 %1126 }
 0x82b   :  { %4784 = vpow2.f32 %v1038_v16  ;;  %4320 = vmatpush3.msra.mxu1 %v1127_v17 }
 0x82c   :  { %4329 = vmatprep.subr.mxu1 %v4878_v36 }
 0x82e   :  { %v1205_v26 = vpop.permute.xlu1 %1204 }
 0x831   :  { %v4783_v19 = vpop.eup %4782 }
 0x832   :  { %v1040_v21 = vsel %vm202_vm2, %v4783_v19, 0.0  ;;  %v1283_v30 = vpop.permute.xlu1 %1282 }
 0x833   :  { %1041 = vadd.xlane.f32.xlu0 %v1040_v21 }
 0x835   :  { %v4785_v22 = vpop.eup %4784 }
 0x836   :  { %v1043_v23 = vsel %vm202_vm2, %v4785_v22, 0.0  ;;  %v1281_v33 = vpop.permute.xlu1 %1280 }
 0x837   :  { %1044 = vadd.xlane.f32.xlu0 %v1043_v23 }
 0x84d   :  { %1202 = vrot.lane.b32.xlu0 %v5030_v41, %s5766_s19 }
 0x8c0   :  { %v1042_v24 = vpop.xlane.xlu0 %1041 }
 0x8c1   :  { %4786 = vrcp.f32 %v1042_v24 }
 0x8c4   :  { %v1045_v25 = vpop.xlane.xlu0 %1044 }
 0x8c5   :  { %4788 = vrcp.f32 %v1045_v25 }
 0x8c8   :  { %v1203_v32 = vpop.permute.xlu0 %1202 }
 0x8cb   :  { %v4787_v27 = vpop.eup %4786 }
 0x8cc   :  { %v1047_v28 = vmul.f32 %v4787_v27, %v4783_v19 }
 0x8ce   :  { %4317 = vmatmul.mubr.msk.f32.vlgmr.msra.gmra.mrb[10].mxu0 %vm202_vm2, %v1047_v28 }
 0x8cf   :  { %v4789_v29 = vpop.eup %4788  ;;  %4325 = vmatpush3.xpose.msk.msra.mxu0 %vm202_vm2, %v1205_v26  ;;  %4326 = vmatprep.mubr.msk.f32.mxu0 %vm4879_vm1, %v4878_v36 }
 0x8d0   :  { %v1049_v31 = vmul.f32 %v4789_v29, %v4785_v22  ;;  %4334 = vmatprep.subr.mxu0 %v4878_v36 }
 0x8d2   :  { %4322 = vmatmul.mubr.msk.f32.vlgmr.msra.gmra.mrb[12].mxu1 %vm202_vm2, %v1049_v31  ;;  %4327 = vmatmul.mubr.msk.f32.vlgmr.msra.gmra.mrb[12].mxu0 %vm202_vm2, %v1203_v32 }
 0x8d3   :  { %4330 = vmatpush3.xpose.msk.msra.mxu1 %vm202_vm2, %v1283_v30  ;;  %4331 = vmatprep.mubr.msk.f32.mxu1 %vm4879_vm1, %v4878_v36 }
 0x8d4   :  { %4339 = vmatprep.subr.mxu1 %v4878_v36  ;;  %4336 = vmatprep.mubr.msk.f32.mxu0 %vm4879_vm1, %v4878_v36 }
 0x8d6   :  { %4332 = vmatmul.mubr.msk.f32.vlgmr.msra.gmra.mrb[14].mxu1 %vm202_vm2, %v1281_v33 }
 0x8d7   :  { %4341 = vmatprep.mubr.msk.f32.mxu1 %vm4879_vm1, %v4878_v36 }
 0x9a1   :  { %v1122_v34 = vpop.f32.mrb[10].mxu0 }
 0x9a2   :  { %v4318_v35 = vpop.f32.mrb[11].mxu0 }
 0x9a5   :  { %v1198_v37 = vpop.f32.mrb[12].mxu1  ;;  %v1276_v38 = vpop.f32.mrb[12].mxu0 }
 0x9a6   :  { %v1358_v40 = vmul.f32 0.35355338, %v1276_v38  ;;  %v4323_v42 = vpop.f32.mrb[13].mxu1  ;;  %v4328_v43 = vpop.f32.mrb[13].mxu0 }
 0x9a8   :  { %v1360_v44 = vsel %vm5048_vm3, %v1358_v40, -1e+30 }
 0x9a9   :  { %v1354_v45 = vpop.f32.mrb[14].mxu1  ;;  %v1362_v46 = vsel %vm202_vm2, %v1360_v44, -inf }
 0x9aa   :  { %v1359_v47 = vmul.f32 0.35355338, %v1354_v45  ;;  %1363 = vmax.xlane.f32.xlu0 %v1362_v46  ;;  %v4333_v49 = vpop.f32.mrb[15].mxu1 }
 0x9ab   :  { %v1706_v49 = vld [vmem:[%s5752_s10] sm:$0xff] }
 0x9ac   :  { %v1361_v50 = vsel %vm5048_vm3, %v1359_v47, -1e+30 }
 0x9ad   :  { %v1365_v51 = vsel %vm202_vm2, %v1361_v50, -inf }
 0x9ae   :  { %1366 = vmax.xlane.f32.xlu1 %v1365_v51 }
 0x9bf   :  { %1460 = vrot.lane.b32.xlu1 %v5028_v39, %s5764_s20 }
 0x9c3   :  { %1538 = vrot.lane.b32.xlu1 %v5132_v58, %s5762_s21 }
 0x9c7   :  { %1540 = vrot.lane.b32.xlu1 %v5134_v60, %s5762_s21 }
 0x9cb   :  { %1548 = vrot.lane.b32.xlu1 %v1198_v37, %s5760_s22 }
 0xa37   :  { %v1364_v52 = vpop.xlane.xlu0 %1363 }
 0xa38   :  { %v1368_v53 = vsub.f32 %v1360_v44, %v1364_v52  ;;  %v1708_v52 = vld [vmem:[%s5752_s10 + $0x10] sm:$0xff] }
 0xa3a   :  { %v1370_v54 = vmul.f32 1.442695, %v1368_v53  ;;  %v1709_v53 = vld [vmem:[%s5752_s10 + $0x18] sm:$0xff] }
 0xa3b   :  { %v1367_v55 = vpop.xlane.xlu1 %1366 }
 0xa3c   :  { %4790 = vpow2.f32 %v1370_v54  ;;  %v1369_v56 = vsub.f32 %v1361_v50, %v1367_v55  ;;  %v1707_v50 = vld [vmem:[%s5752_s10 + $0x8] sm:$0xff]  ;;  %v4604_v54 = vpack.c.bf16 %v1709_v53, %v1708_v52  ;;  %v1808_v55 = vld [vmem:[%s5754_s12] sm:$0xff] }
 0xa3d   :  { %v4600_v51 = vpack.c.bf16 %v1707_v50, %v1706_v49  ;;  %v4004_v50 = vld [vmem:[%s5755_s13] ss:$0 sm:$0xff] }
 0xa3e   :  { %v1372_v57 = vmul.f32 1.442695, %v1369_v56  ;;  %v1809_v56 = vld [vmem:[%s5754_s12 + $0x8] sm:$0xff] }
 0xa3f   :  { %v1461_v59 = vpop.permute.xlu1 %1460 }
 0xa40   :  { %4792 = vpow2.f32 %v1372_v57  ;;  %4340 = vmatpush3.msra.mxu1 %v1461_v59  ;;  %v4608_v57 = vpack.c.bf16 %v1809_v56, %v1808_v55 }
 0xa41   :  { %4412 = vmatprep.subr.mxu1 %v4878_v36 }
 0xa43   :  { %v1539_v16 = vpop.permute.xlu1 %1538 }
 0xa44   :  { %v1560_v21 = vsel %vm202_vm2, %v5090_v18, %v1539_v16  ;;  %v3996_v18 = vld [vmem:[%s5749_s7] ss:$0 sm:$0xff]  ;;  %v1814_v16 = vld [vmem:[%s5754_s12 + $0x30] sm:$0xff] }
 0xa46   :  { %v4791_v39 = vpop.eup %4790 }
 0xa47   :  { %v1374_v58 = vsel %vm202_vm2, %v4791_v39, 0.0  ;;  %v1541_v17 = vpop.permute.xlu1 %1540 }
 0xa48   :  { %1375 = vadd.xlane.f32.xlu0 %v1374_v58  ;;  %v1561_v26 = vsel %vm202_vm2, %v5092_v20, %v1541_v17  ;;  %v1815_v17 = vld [vmem:[%s5754_s12 + $0x38] sm:$0xff] }
 0xa4a   :  { %v4793_v60 = vpop.eup %4792 }
 0xa4b   :  { %v1377_v61 = vsel %vm202_vm2, %v4793_v60, 0.0  ;;  %v1549_v22 = vpop.permute.xlu1 %1548 }
 0xa4c   :  { %1378 = vadd.xlane.f32.xlu0 %v1377_v61  ;;  %v1564_v27 = vsel %vm1562_vm5, %v1561_v26, %v1549_v22  ;;  %v1817_v22 = vld [vmem:[%s5754_s12 + $0x48] sm:$0xff] }
 0xa62   :  { %1384 = vrot.lane.b32.xlu0 %v5030_v41, %s5764_s20  ;;  %v1568_v41 = vld [vmem:[%s5748_s6] sm:$0xff]  ;;  %s5784_s20 = smov 24  }
 0xa63   :  { %v4592_v8 = vpack.c.bf16 %v1569_v7, %v1568_v41 }
 0xa66   :  { %1546 = vrot.lane.b32.xlu0 %v1122_v34, %s5760_s22 }
 0xad5   :  { %v1376_v62 = vpop.xlane.xlu0 %1375 }
 0xad6   :  { %4794 = vrcp.f32 %v1376_v62 }
 0xad9   :  { %v1379_v63 = vpop.xlane.xlu0 %1378 }
 0xada   :  { %4796 = vrcp.f32 %v1379_v63 }
 0xadd   :  { %v1385_v2 = vpop.permute.xlu0 %1384 }
 0xade   :  { %4335 = vmatpush3.msra.mxu0 %v1385_v2  ;;  %v3999_v2 = vld [vmem:[%s5750_s8] ss:$0 sm:$0xff] }
 0xadf   :  { %4593 = vmatprep.subr.bf16.mxu0 %v4592_v8 }
 0xae0   :  { %v4795_v3 = vpop.eup %4794 }
 0xae1   :  { %v1381_v4 = vmul.f32 %v4795_v3, %v4791_v39  ;;  %v1547_v19 = vpop.permute.xlu0 %1546 }
 0xae2   :  { %v1563_v23 = vsel %vm1562_vm5, %v1560_v21, %v1547_v19  ;;  %v4620_v19 = vpack.c.bf16 %v1815_v17, %v1814_v16  ;;  %v1816_v21 = vld [vmem:[%s5754_s12 + $0x40] sm:$0xff] }
 0xae3   :  { %4337 = vmatmul.mubr.msk.f32.vlgmr.msra.gmra.mrb[14].mxu0 %vm202_vm2, %v1381_v4  ;;  %v4000_v4 = vld [vmem:[%s5751_s9] ss:$0 sm:$0xff]  ;;  %v4007_v16 = vld [vmem:[%s5744_s2 + $0x1] ss:$0 sm:$0xff] }
 0xae4   :  { %v4797_v5 = vpop.eup %4796  ;;  %4595 = vmatpush3.bf16.msra.mxu0 %v4592_v8  ;;  %v1810_v8 = vld [vmem:[%s5754_s12 + $0x10] sm:$0xff] }
 0xae5   :  { %v1383_v6 = vmul.f32 %v4797_v5, %v4793_v60  ;;  %4597 = vmatprep.subr.bf16.mxu0 %v4596_v11 }
 0xae7   :  { %4342 = vmatmul.mubr.msk.f32.vlgmr.msra.gmra.mrb[16].mxu1 %vm202_vm2, %v1383_v6 }
 0xae8   :  { %4414 = vmatprep.mubr.msk.f32.mxu1 %vm4879_vm1, %v4878_v36  ;;  %4599 = vmatpush3.bf16.msra.mxu0 %v4596_v11 }
 0xae9   :  { %4601 = vmatprep.subr.bf16.mxu0 %v4600_v51 }
 0xbb6   :  { %v1456_v12 = vpop.f32.mrb[14].mxu0 }
 0xbb7   :  { %1554 = vrot.lane.b32.xlu0 %v1456_v12, %s5772_s23  ;;  %v4338_v13 = vpop.f32.mrb[15].mxu0  ;;  %v4612_v12 = vpack.c.bf16 %v1811_v9, %v1810_v8 }
 0xbb8   :  { %v1812_v13 = vld [vmem:[%s5754_s12 + $0x20] sm:$0xff] }
 0xbba   :  { %v1532_v14 = vpop.f32.mrb[16].mxu1 }
 0xbbb   :  { %1556 = vrot.lane.b32.xlu1 %v1532_v14, %s5772_s23  ;;  %v4343_v15 = vpop.f32.mrb[17].mxu1  ;;  %v1813_v14 = vld [vmem:[%s5754_s12 + $0x28] sm:$0xff] }
 0xbbc   :  { %v4616_v15 = vpack.c.bf16 %v1813_v14, %v1812_v13 }
 0xc29   :  { %v1555_v24 = vpop.permute.xlu0 %1554 }
 0xc2a   :  { %v1566_v25 = vsel %vm1565_vm4, %v1563_v23, %v1555_v24  ;;  %v4624_v23 = vpack.c.bf16 %v1817_v22, %v1816_v21  ;;  %v1818_v24 = vld [vmem:[%s5754_s12 + $0x50] sm:$0xff]  ;;  %v4008_v22 = vld [vmem:[%s5745_s3 + $0x1] ss:$0 sm:$0xff]  ;;  %s5778_s3 = smov 48  }
 0xc2b   :  { %4352 = vmatprep.mubr.msk.f32.mxu0 %vm63_vm0, %v1566_v25  ;;  %v1819_v25 = vld [vmem:[%s5754_s12 + $0x58] sm:$0xff] }
 0xc2c   :  { %v4628_v26 = vpack.c.bf16 %v1819_v25, %v1818_v24 }
 0xc2d   :  { %v1557_v28 = vpop.permute.xlu1 %1556 }
 0xc2e   :  { %v1567_v29 = vsel %vm1565_vm4, %v1564_v27, %v1557_v28  ;;  %v1820_v27 = vld [vmem:[%s5754_s12 + $0x60] sm:$0xff]  ;;  %v1821_v28 = vld [vmem:[%s5754_s12 + $0x68] sm:$0xff] }
 0xc2f   :  { %4353 = vmatmul.mubr.msk.f32.vlgmr.msra.gmra.mrb[16].mxu0 %vm63_vm0, %v1567_v29  ;;  %v4632_v29 = vpack.c.bf16 %v1821_v28, %v1820_v27  ;;  %v4014_v27 = vld [vmem:[%s5747_s5 + $0x1] ss:$0 sm:$0xff]  ;;  %s5779_s5 = smov 72  }
 0xc30   :  { %4603 = vmatpush3.bf16.msra.mxu0 %v4600_v51 }
 0xc31   :  { %4605 = vmatprep.subr.bf16.mxu0 %v4604_v54 }
 0xc34   :  { %4607 = vmatpush3.bf16.msra.mxu0 %v4604_v54 }
 0xc35   :  { %4609 = vmatprep.subr.bf16.mxu0 %v4608_v57 }
 0xd02   :  { %v4354_v30 = vpop.f32.mrb[16].mxu0 }
 0xd03   :  { %v1657_v31 = vadd.f32 %v4354_v30, %v3996_v18  ;;  %v1651_v32 = vpop.f32.mrb[17].mxu0  ;;  %v1823_v30 = vld [vmem:[%s5754_s12 + $0x78] sm:$0xff] }
 0xd04   :  { %v1652_v33 = vadd.f32 %v3996_v18, %v1651_v32  ;;  %v1822_v18 = vld [vmem:[%s5754_s12 + $0x70] sm:$0xff]  ;;  %v4001_v32 = vld [vmem:[%s5753_s11] ss:$0 sm:$0xff] }
 0xd05   :  { %v5225_v34 = vadd.f32 %v1657_v31, %v4989_v1  ;;  %v4636_v31 = vpack.c.bf16 %v1823_v30, %v1822_v18 }
 0xd06   :  { %v5228_v20 = vadd.f32 %v1652_v33, %v4984_v0 }
 0xd07   :  { %v1667_v35 = vsel %vm63_vm0, %v5225_v34, 0.0 }
 0xd08   :  { %1668 = vadd.xlane.f32.xlu1 %v1667_v35  ;;  %v1664_v37 = vsel %vm63_vm0, %v5228_v20, 0.0 }
 0xd09   :  { %1665 = vadd.xlane.f32.xlu0 %v1664_v37 }
 0xd95   :  { %v1669_v38 = vpop.xlane.xlu1 %1668 }
 0xd96   :  { %v1671_v40 = vmul.f32 0.03125, %v1669_v38  ;;  %v1666_v42 = vpop.xlane.xlu0 %1665 }
 0xd97   :  { %v1670_v43 = vmul.f32 0.03125, %v1666_v42 }
 0xd98   :  { %v1673_v44 = vsub.f32 %v5225_v34, %v1671_v40 }
 0xd99   :  { %v1672_v1 = vsub.f32 %v5228_v20, %v1670_v43 }
 0xd9a   :  { %v1675_v46 = vmul.f32 %v1673_v44, %v1673_v44 }
 0xd9b   :  { %v1674_v45 = vmul.f32 %v1672_v1, %v1672_v1 }
 0xd9c   :  { %v1679_v47 = vsel %vm63_vm0, %v1675_v46, 0.0 }
 0xd9d   :  { %v1676_v0 = vsel %vm63_vm0, %v1674_v45, 0.0 }
 0xd9e   :  { %1677 = vadd.xlane.f32.xlu0 %v1676_v0 }
 0xda2   :  { %1680 = vadd.xlane.f32.xlu0 %v1679_v47 }
 0xe2b   :  { %v1678_v59 = vpop.xlane.xlu0 %1677 }
 0xe2c   :  { %v1682_v39 = vmul.f32 0.03125, %v1678_v59 }
 0xe2e   :  { %v1684_v58 = vadd.f32 1e-05, %v1682_v39 }
 0xe2f   :  { %v1681_v60 = vpop.xlane.xlu0 %1680 }
 0xe30   :  { %4798 = vrsqrt.f32 %v1684_v58  ;;  %v1683_v61 = vmul.f32 0.03125, %v1681_v60 }
 0xe32   :  { %v1685_v62 = vadd.f32 1e-05, %v1683_v61 }
 0xe34   :  { %4800 = vrsqrt.f32 %v1685_v62 }
 0xe3a   :  { %v4799_v63 = vpop.eup %4798 }
 0xe3b   :  { %v1688_v3 = vmul.f32 %v4799_v63, %v1672_v1 }
 0xe3d   :  { %v1696_v5 = vmul.f32 %v3999_v2, %v1688_v3 }
 0xe3e   :  { %v4801_v6 = vpop.eup %4800 }
 0xe3f   :  { %v1689_v41 = vmul.f32 %v4801_v6, %v1673_v44  ;;  %v1704_v7 = vadd.f32 %v4000_v4, %v1696_v5  ;;  %v4010_v5 = vld [vmem:[%s5746_s4 + $0x28] sm:$0xff] }
 0xe41   :  { %v1697_v10 = vmul.f32 %v3999_v2, %v1689_v41  ;;  %4363 = vmatprep.mubr.msk.f32.mxu0 %vm63_vm0, %v1704_v7  ;;  %v4011_v41 = vld [vmem:[%s5746_s4 + $0x30] sm:$0xff]  ;;  %v4012_v7 = vld [vmem:[%s5746_s4 + $0x38] sm:$0xff] }
 0xe42   :  { %v4644_v8 = vpack.c.bf16 %v4012_v7, %v4011_v41 }
 0xe43   :  { %v1705_v11 = vadd.f32 %v4000_v4, %v1697_v10  ;;  %v4009_v4 = vld [vmem:[%s5746_s4 + $0x20] sm:$0xff] }
 0xe44   :  { %v4640_v6 = vpack.c.bf16 %v4010_v5, %v4009_v4 }
 0xe45   :  { %4364 = vmatmul.mubr.msk.f32.vlgmr.msra.gmra.mrb[18].mxu0 %vm63_vm0, %v1705_v11 }
 0xe46   :  { %4611 = vmatpush3.bf16.msra.mxu0 %v4608_v57 }
 0xe47   :  { %4613 = vmatprep.subr.bf16.mxu0 %v4612_v12 }
 0xe4a   :  { %4615 = vmatpush3.bf16.msra.mxu0 %v4612_v12 }
 0xe4b   :  { %4617 = vmatprep.subr.bf16.mxu0 %v4616_v15 }
 0xe4e   :  { %4619 = vmatpush3.bf16.msra.mxu0 %v4616_v15 }
 0xe4f   :  { %4621 = vmatprep.subr.bf16.mxu0 %v4620_v19 }
 0xe52   :  { %4623 = vmatpush3.bf16.msra.mxu0 %v4620_v19 }
 0xe53   :  { %4625 = vmatprep.subr.bf16.mxu0 %v4624_v23 }
 0xe56   :  { %4627 = vmatpush3.bf16.msra.mxu0 %v4624_v23 }
 0xe57   :  { %4629 = vmatprep.subr.bf16.mxu0 %v4628_v26 }
 0xe5a   :  { %4631 = vmatpush3.bf16.msra.mxu0 %v4628_v26 }
 0xe5b   :  { %4633 = vmatprep.subr.bf16.mxu0 %v4632_v29 }
 0xe5e   :  { %4635 = vmatpush3.bf16.msra.mxu0 %v4632_v29 }
 0xe5f   :  { %4637 = vmatprep.subr.bf16.mxu0 %v4636_v31 }
 0xe62   :  { %4639 = vmatpush3.bf16.msra.mxu0 %v4636_v31 }
 0xe63   :  { %4641 = vmatprep.subr.bf16.mxu0 %v4640_v6 }
 0xf18   :  { %v4365_v33 = vpop.f32.mrb[18].mxu0 }
 0xf19   :  { %v1795_v35 = vadd.f32 %v4365_v33, %v4001_v32  ;;  %v1789_v37 = vpop.f32.mrb[19].mxu0 }
 0xf1a   :  { %v1790_v38 = vadd.f32 %v4001_v32, %v1789_v37 }
 0xf1b   :  { %v1801_v40 = vmul.f32 0.70710677, %v1795_v35  ;;  %v1799_v46 = vmul.f32 0.5, %v1795_v35 }
 0xf1c   :  { %v1800_v42 = vmul.f32 0.70710677, %v1790_v38  ;;  %v1798_v45 = vmul.f32 0.5, %v1790_v38 }
 0xf1d   :  { %4802 = verf.f32 %v1801_v40 }
 0xf1e   :  { %4804 = verf.f32 %v1800_v42 }
 0xf27   :  { %v4803_v43 = vpop.eup %4802 }
 0xf28   :  { %v4805_v44 = vpop.eup %4804  ;;  %v1805_v1 = vadd.f32 1.0, %v4803_v43 }
 0xf29   :  { %v1804_v0 = vadd.f32 1.0, %v4805_v44 }
 0xf2a   :  { %v1807_v49 = vmul.f32 %v1805_v1, %v1799_v46 }
 0xf2b   :  { %v1806_v47 = vmul.f32 %v1804_v0, %v1798_v45 }
 0xf2d   :  { %4398 = vmatprep.mubr.f32.mxu0 %v1806_v47 }
 0xf2e   :  { %4399 = vmatmul.mubr.f32.vlgmr.msra.gmra.mrb[20].mxu0 %v1807_v49 }
 0xf2f   :  { %4643 = vmatpush3.bf16.msra.mxu0 %v4640_v6 }
 0xf30   :  { %4645 = vmatprep.subr.bf16.mxu0 %v4644_v8 }
 0xf33   :  { %4647 = vmatpush3.bf16.msra.mxu0 %v4644_v8 }
 0xf34   :  { %4442 = vmatprep.subr.mxu0 %v4878_v36 }
0x1001   :  { %v4400_v51 = vpop.f32.mrb[20].mxu0 }
0x1002   :  { %v1903_v52 = vadd.f32 %v4400_v51, %v4004_v50  ;;  %v1897_v53 = vpop.f32.mrb[21].mxu0 }
0x1003   :  { %v1898_v54 = vadd.f32 %v4004_v50, %v1897_v53 }
0x1004   :  { %v5313_v55 = vadd.f32 %v1903_v52, %v5225_v34 }
0x1005   :  { %v5316_v56 = vadd.f32 %v1898_v54, %v5228_v20 }
0x1006   :  { %v1915_v57 = vsel %vm63_vm0, %v5313_v55, 0.0 }
0x1007   :  { %1916 = vadd.xlane.f32.xlu1 %v1915_v57  ;;  %v1912_v59 = vsel %vm63_vm0, %v5316_v56, 0.0 }
0x1008   :  { %1913 = vadd.xlane.f32.xlu0 %v1912_v59 }
0x1094   :  { %v1917_v39 = vpop.xlane.xlu1 %1916 }
0x1095   :  { %v1919_v58 = vmul.f32 0.03125, %v1917_v39  ;;  %v1914_v60 = vpop.xlane.xlu0 %1913 }
0x1096   :  { %v1918_v61 = vmul.f32 0.03125, %v1914_v60 }
0x1097   :  { %v1921_v62 = vsub.f32 %v5313_v55, %v1919_v58 }
0x1098   :  { %v1920_v34 = vsub.f32 %v5316_v56, %v1918_v61 }
0x1099   :  { %v1923_v63 = vmul.f32 %v1921_v62, %v1921_v62 }
0x109a   :  { %v1922_v2 = vmul.f32 %v1920_v34, %v1920_v34 }
0x109b   :  { %v1927_v20 = vsel %vm63_vm0, %v1923_v63, 0.0 }
0x109c   :  { %1928 = vadd.xlane.f32.xlu1 %v1927_v20  ;;  %v1924_v3 = vsel %vm63_vm0, %v1922_v2, 0.0 }
0x109d   :  { %1925 = vadd.xlane.f32.xlu0 %v1924_v3 }
0x1129   :  { %v1929_v9 = vpop.xlane.xlu1 %1928 }
0x112a   :  { %v1931_v10 = vmul.f32 0.03125, %v1929_v9  ;;  %v1926_v11 = vpop.xlane.xlu0 %1925 }
0x112b   :  { %v1930_v12 = vmul.f32 0.03125, %v1926_v11 }
0x112c   :  { %v1933_v13 = vadd.f32 1e-05, %v1931_v10 }
0x112d   :  { %v1932_v14 = vadd.f32 1e-05, %v1930_v12 }
0x112e   :  { %4806 = vrsqrt.f32 %v1933_v13 }
0x112f   :  { %4808 = vrsqrt.f32 %v1932_v14 }
0x1138   :  { %v4807_v15 = vpop.eup %4806 }
0x1139   :  { %v4809_v17 = vpop.eup %4808  ;;  %v1937_v19 = vmul.f32 %v4807_v15, %v1921_v62 }
0x113a   :  { %v1936_v21 = vmul.f32 %v4809_v17, %v1920_v34 }
0x113b   :  { %v1945_v23 = vmul.f32 %v4007_v16, %v1937_v19 }
0x113c   :  { %v1944_v24 = vmul.f32 %v4007_v16, %v1936_v21 }
0x113d   :  { %v1953_v26 = vadd.f32 %v4008_v22, %v1945_v23 }
0x113e   :  { %v1952_v25 = vadd.f32 %v4008_v22, %v1944_v24 }
0x1140   :  { %4409 = vmatprep.mubr.msk.f32.mxu0 %vm63_vm0, %v1952_v25 }
0x1141   :  { %4410 = vmatmul.mubr.msk.f32.vlgmr.msra.gmra.mrb[22].mxu0 %vm63_vm0, %v1953_v26 }
0x1142   :  { %4444 = vmatprep.mubr.msk.f32.mxu0 %vm4879_vm1, %v4878_v36 }
0x1214   :  { %v4411_v28 = vpop.f32.mrb[22].mxu0 }
0x1215   :  { %v5352_v29 = vadd.f32 %v4411_v28, %v4014_v27  ;;  %v2039_v18 = vpop.f32.mrb[23].mxu0 }
0x1216   :  { %v5354_v30 = vadd.f32 %v4014_v27, %v2039_v18 }
0x1217   :  { %2126 = vrot.lane.b32.xlu1 %v5352_v29, %s4880_s25 }
0x1218   :  { %2049 = vrot.lane.b32.xlu0 %v5354_v30, %s4880_s25  ;;  %s5780_s25 = smov 104  }
0x1289   :  { %v2127_v32 = vpop.permute.xlu1 %2126 }
0x128a   :  { %v2050_v31 = vpop.permute.xlu0 %2049 }
0x128b   :  { %4413 = vmatpush3.xpose.msk.msra.mxu1 %vm202_vm2, %v2050_v31 }
0x128c   :  { %4417 = vmatprep.subr.mxu1 %v4878_v36 }
0x128e   :  { %4415 = vmatmul.mubr.msk.f32.vlgmr.msra.gmra.mrb[18].mxu1 %vm202_vm2, %v5354_v30 }
0x128f   :  { %4418 = vmatpush3.xpose.msk.msra.mxu1 %vm202_vm2, %v2127_v32  ;;  %4419 = vmatprep.mubr.msk.f32.mxu1 %vm4879_vm1, %v4878_v36 }
0x1290   :  { %4422 = vmatprep.subr.mxu1 %v4878_v36 }
0x1292   :  { %4420 = vmatmul.mubr.msk.f32.vlgmr.msra.gmra.mrb[20].mxu1 %vm202_vm2, %v5352_v29 }
0x1293   :  { %4424 = vmatprep.mubr.msk.f32.mxu1 %vm4879_vm1, %v4878_v36 }
0x1361   :  { %v2121_v33 = vpop.f32.mrb[18].mxu1 }
0x1362   :  { %v2202_v35 = vmul.f32 0.35355338, %v2121_v33  ;;  %v4416_v37 = vpop.f32.mrb[19].mxu1 }
0x1364   :  { %v2204_v38 = vsel %vm5048_vm3, %v2202_v35, -1e+30 }
0x1365   :  { %v2198_v40 = vpop.f32.mrb[20].mxu1  ;;  %v2206_v42 = vsel %vm202_vm2, %v2204_v38, -inf }
0x1366   :  { %v2203_v43 = vmul.f32 0.35355338, %v2198_v40  ;;  %2207 = vmax.xlane.f32.xlu1 %v2206_v42  ;;  %v4421_v44 = vpop.f32.mrb[21].mxu1 }
0x1368   :  { %v2205_v1 = vsel %vm5048_vm3, %v2203_v43, -1e+30 }
0x1369   :  { %v2209_v45 = vsel %vm202_vm2, %v2205_v1, -inf }
0x136a   :  { %2210 = vmax.xlane.f32.xlu0 %v2209_v45 }
0x1377   :  { %2304 = vrot.lane.b32.xlu1 %v5352_v29, %s4881_s26 }
0x137b   :  { %2382 = vrot.lane.b32.xlu1 %v5354_v30, %s4882_s27 }
0x137f   :  { %2380 = vrot.lane.b32.xlu1 %v5354_v30, %s4883_s28 }
0x13f3   :  { %v2208_v0 = vpop.xlane.xlu1 %2207 }
0x13f4   :  { %v2212_v46 = vsub.f32 %v2204_v38, %v2208_v0 }
0x13f6   :  { %v2214_v47 = vmul.f32 1.442695, %v2212_v46 }
0x13f7   :  { %v2211_v49 = vpop.xlane.xlu0 %2210  ;;  %v2305_v59 = vpop.permute.xlu1 %2304 }
0x13f8   :  { %4810 = vpow2.f32 %v2214_v47  ;;  %v2213_v50 = vsub.f32 %v2205_v1, %v2211_v49 }
0x13fa   :  { %v2216_v51 = vmul.f32 1.442695, %v2213_v50 }
0x13fb   :  { %v2383_v39 = vpop.permute.xlu1 %2382 }
0x13fc   :  { %4812 = vpow2.f32 %v2216_v51 }
0x13ff   :  { %v2381_v58 = vpop.permute.xlu1 %2380 }
0x1402   :  { %v4811_v52 = vpop.eup %4810 }
0x1403   :  { %v2218_v53 = vsel %vm202_vm2, %v4811_v52, 0.0 }
0x1404   :  { %2219 = vadd.xlane.f32.xlu0 %v2218_v53 }
0x1406   :  { %v4813_v54 = vpop.eup %4812 }
0x1407   :  { %v2221_v57 = vsel %vm202_vm2, %v4813_v54, 0.0 }
0x1408   :  { %2222 = vadd.xlane.f32.xlu1 %v2221_v57 }
0x1419   :  { %2458 = vrot.lane.b32.xlu1 %v5352_v29, %s4883_s28  ;;  %s5783_s28 = smov 16  }
0x141a   :  { %2228 = vrot.lane.b32.xlu0 %v5354_v30, %s4881_s26  ;;  %s5781_s26 = smov 40  }
0x141e   :  { %2460 = vrot.lane.b32.xlu0 %v5352_v29, %s4882_s27  ;;  %s5782_s27 = smov 8  }
0x1491   :  { %v2220_v60 = vpop.xlane.xlu0 %2219 }
0x1492   :  { %4814 = vrcp.f32 %v2220_v60 }
0x1495   :  { %v2223_v61 = vpop.xlane.xlu1 %2222  ;;  %v2229_v62 = vpop.permute.xlu0 %2228 }
0x1496   :  { %4816 = vrcp.f32 %v2223_v61  ;;  %4423 = vmatpush3.msra.mxu1 %v2229_v62 }
0x1497   :  { %4427 = vmatprep.subr.mxu1 %v4878_v36 }
0x1499   :  { %v2461_v3 = vpop.permute.xlu0 %2460  ;;  %v2459_v4 = vpop.permute.xlu1 %2458 }
0x149c   :  { %v4815_v34 = vpop.eup %4814 }
0x149d   :  { %v2225_v63 = vmul.f32 %v4815_v34, %v4811_v52 }
0x149f   :  { %4425 = vmatmul.mubr.msk.f32.vlgmr.msra.gmra.mrb[22].mxu1 %vm202_vm2, %v2225_v63 }
0x14a0   :  { %v4817_v2 = vpop.eup %4816  ;;  %4428 = vmatpush3.msra.mxu1 %v2305_v59  ;;  %4429 = vmatprep.mubr.msk.f32.mxu1 %vm4879_vm1, %v4878_v36 }
0x14a1   :  { %v2227_v20 = vmul.f32 %v4817_v2, %v4813_v54  ;;  %4432 = vmatprep.subr.mxu1 %v4878_v36 }
0x14a3   :  { %4430 = vmatmul.mubr.msk.f32.vlgmr.msra.gmra.mrb[24].mxu1 %vm202_vm2, %v2227_v20 }
0x14a4   :  { %4434 = vmatprep.mubr.msk.f32.mxu1 %vm4879_vm1, %v4878_v36 }
0x14a7   :  { %4433 = vmatpush3.xpose.msk.msra.mxu1 %vm202_vm2, %v2383_v39 }
0x14a8   :  { %4437 = vmatprep.subr.mxu1 %v4878_v36 }
0x14aa   :  { %4435 = vmatmul.mubr.msk.f32.vlgmr.msra.gmra.mrb[26].mxu1 %vm202_vm2, %v2381_v58 }
0x14ab   :  { %4438 = vmatpush3.xpose.msk.msra.mxu1 %vm202_vm2, %v2461_v3  ;;  %4439 = vmatprep.mubr.msk.f32.mxu1 %vm4879_vm1, %v4878_v36 }
0x14ac   :  { %4447 = vmatprep.subr.mxu1 %v4878_v36 }
0x14ae   :  { %4440 = vmatmul.mubr.msk.f32.vlgmr.msra.gmra.mrb[28].mxu1 %vm202_vm2, %v2459_v4 }
0x14af   :  { %4449 = vmatprep.mubr.msk.f32.mxu1 %vm4879_vm1, %v4878_v36 }
0x1572   :  { %v5410_v5 = vpop.f32.mrb[22].mxu1 }
0x1573   :  { %v4426_v6 = vpop.f32.mrb[23].mxu1 }
0x1576   :  { %v5412_v41 = vpop.f32.mrb[24].mxu1 }
0x1577   :  { %v4431_v7 = vpop.f32.mrb[25].mxu1 }
0x157d   :  { %v2454_v8 = vpop.f32.mrb[26].mxu1 }
0x157e   :  { %v2536_v9 = vmul.f32 0.35355338, %v2454_v8  ;;  %v4436_v10 = vpop.f32.mrb[27].mxu1 }
0x1580   :  { %v2538_v11 = vsel %vm5048_vm3, %v2536_v9, -1e+30 }
0x1581   :  { %v2532_v12 = vpop.f32.mrb[28].mxu1  ;;  %v2540_v13 = vsel %vm202_vm2, %v2538_v11, -inf }
0x1582   :  { %v2537_v14 = vmul.f32 0.35355338, %v2532_v12  ;;  %2541 = vmax.xlane.f32.xlu0 %v2540_v13  ;;  %v4441_v15 = vpop.f32.mrb[29].mxu1 }
0x1584   :  { %v2539_v16 = vsel %vm5048_vm3, %v2537_v14, -1e+30 }
0x1585   :  { %v2543_v17 = vsel %vm202_vm2, %v2539_v16, -inf }
0x1586   :  { %2544 = vmax.xlane.f32.xlu1 %v2543_v17 }
0x1597   :  { %2638 = vrot.lane.b32.xlu1 %v5352_v29, %s4884_s29 }
0x1598   :  { %2562 = vrot.lane.b32.xlu0 %v5354_v30, %s4884_s29 }
0x159b   :  { %2716 = vrot.lane.b32.xlu1 %v5354_v30, %s4885_s30 }
0x159f   :  { %2794 = vrot.lane.b32.xlu1 %v5352_v29, %s4885_s30 }
0x15a3   :  { %2792 = vrot.lane.b32.xlu1 %v5352_v29, %s4886_s0 }
0x160f   :  { %v2542_v19 = vpop.xlane.xlu0 %2541 }
0x1610   :  { %v2546_v21 = vsub.f32 %v2538_v11, %v2542_v19 }
0x1612   :  { %v2548_v22 = vmul.f32 1.442695, %v2546_v21 }
0x1613   :  { %v2563_v23 = vpop.permute.xlu0 %2562  ;;  %v2545_v24 = vpop.xlane.xlu1 %2544 }
0x1614   :  { %4818 = vpow2.f32 %v2548_v22  ;;  %v2547_v25 = vsub.f32 %v2539_v16, %v2545_v24  ;;  %4443 = vmatpush3.msra.mxu0 %v2563_v23 }
0x1615   :  { %4452 = vmatprep.subr.mxu0 %v4878_v36 }
0x1616   :  { %v2550_v26 = vmul.f32 1.442695, %v2547_v25 }
0x1617   :  { %v2639_v27 = vpop.permute.xlu1 %2638 }
0x1618   :  { %4820 = vpow2.f32 %v2550_v26  ;;  %4448 = vmatpush3.msra.mxu1 %v2639_v27 }
0x1619   :  { %4457 = vmatprep.subr.mxu1 %v4878_v36 }
0x161b   :  { %v2717_v37 = vpop.permute.xlu1 %2716 }
0x161e   :  { %v4819_v28 = vpop.eup %4818 }
0x161f   :  { %v2552_v18 = vsel %vm202_vm2, %v4819_v28, 0.0  ;;  %v2795_v43 = vpop.permute.xlu1 %2794 }
0x1620   :  { %2553 = vadd.xlane.f32.xlu0 %v2552_v18 }
0x1622   :  { %v4821_v31 = vpop.eup %4820 }
0x1623   :  { %v2555_v32 = vsel %vm202_vm2, %v4821_v31, 0.0  ;;  %v2793_v45 = vpop.permute.xlu1 %2792 }
0x1624   :  { %2556 = vadd.xlane.f32.xlu0 %v2555_v32 }
0x163a   :  { %2714 = vrot.lane.b32.xlu0 %v5354_v30, %s4886_s0 }
0x16ad   :  { %v2554_v33 = vpop.xlane.xlu0 %2553 }
0x16ae   :  { %4822 = vrcp.f32 %v2554_v33 }
0x16b1   :  { %v2557_v35 = vpop.xlane.xlu0 %2556 }
0x16b2   :  { %4824 = vrcp.f32 %v2557_v35 }
0x16b5   :  { %v2715_v1 = vpop.permute.xlu0 %2714 }
0x16b8   :  { %v4823_v38 = vpop.eup %4822 }
0x16b9   :  { %v2559_v40 = vmul.f32 %v4823_v38, %v4819_v28 }
0x16bb   :  { %4445 = vmatmul.mubr.msk.f32.vlgmr.msra.gmra.mrb[24].mxu0 %vm202_vm2, %v2559_v40 }
0x16bc   :  { %v4825_v42 = vpop.eup %4824  ;;  %4453 = vmatpush3.xpose.msk.msra.mxu0 %vm202_vm2, %v2717_v37  ;;  %4454 = vmatprep.mubr.msk.f32.mxu0 %vm4879_vm1, %v4878_v36 }
0x16bd   :  { %v2561_v44 = vmul.f32 %v4825_v42, %v4821_v31  ;;  %4462 = vmatprep.subr.mxu0 %v4878_v36 }
0x16bf   :  { %4450 = vmatmul.mubr.msk.f32.vlgmr.msra.gmra.mrb[30].mxu1 %vm202_vm2, %v2561_v44  ;;  %4455 = vmatmul.mubr.msk.f32.vlgmr.msra.gmra.mrb[26].mxu0 %vm202_vm2, %v2715_v1 }
0x16c0   :  { %4458 = vmatpush3.xpose.msk.msra.mxu1 %vm202_vm2, %v2795_v43  ;;  %4459 = vmatprep.mubr.msk.f32.mxu1 %vm4879_vm1, %v4878_v36 }
0x16c1   :  { %4467 = vmatprep.subr.mxu1 %v4878_v36  ;;  %4464 = vmatprep.mubr.msk.f32.mxu0 %vm4879_vm1, %v4878_v36 }
0x16c3   :  { %4460 = vmatmul.mubr.msk.f32.vlgmr.msra.gmra.mrb[32].mxu1 %vm202_vm2, %v2793_v45 }
0x16c4   :  { %4469 = vmatprep.mubr.msk.f32.mxu1 %vm4879_vm1, %v4878_v36 }
0x178e   :  { %v5452_v0 = vpop.f32.mrb[24].mxu0 }
0x178f   :  { %v4446_v46 = vpop.f32.mrb[25].mxu0 }
0x1792   :  { %v5454_v47 = vpop.f32.mrb[30].mxu1  ;;  %v2788_v49 = vpop.f32.mrb[26].mxu0 }
0x1793   :  { %v2870_v50 = vmul.f32 0.35355338, %v2788_v49  ;;  %v4451_v51 = vpop.f32.mrb[31].mxu1  ;;  %v4456_v52 = vpop.f32.mrb[27].mxu0 }
0x1795   :  { %v2872_v53 = vsel %vm5048_vm3, %v2870_v50, -1e+30 }
0x1796   :  { %v2866_v54 = vpop.f32.mrb[32].mxu1  ;;  %v2874_v57 = vsel %vm202_vm2, %v2872_v53, -inf }
0x1797   :  { %v2871_v59 = vmul.f32 0.35355338, %v2866_v54  ;;  %2875 = vmax.xlane.f32.xlu0 %v2874_v57  ;;  %v4461_v39 = vpop.f32.mrb[33].mxu1  ;;  %v4042_v57 = vld [vmem:[%s5748_s6 + $0x28] sm:$0xff] }
0x1798   :  { %v4043_v39 = vld [vmem:[%s5748_s6 + $0x30] sm:$0xff] }
0x1799   :  { %v2873_v58 = vsel %vm5048_vm3, %v2871_v59, -1e+30 }
0x179a   :  { %v2877_v60 = vsel %vm202_vm2, %v2873_v58, -inf }
0x179b   :  { %2878 = vmax.xlane.f32.xlu1 %v2877_v60 }
0x17ac   :  { %2972 = vrot.lane.b32.xlu1 %v5352_v29, %s5778_s3 }
0x17ad   :  { %2896 = vrot.lane.b32.xlu0 %v5354_v30, %s5778_s3 }
0x17b0   :  { %3050 = vrot.lane.b32.xlu1 %v5354_v30, %s5779_s5 }
0x17b4   :  { %3128 = vrot.lane.b32.xlu1 %v5352_v29, %s5779_s5 }
0x17b8   :  { %3126 = vrot.lane.b32.xlu1 %v5352_v29, %s5780_s25 }
0x1824   :  { %v2876_v61 = vpop.xlane.xlu0 %2875 }
0x1825   :  { %v2880_v62 = vsub.f32 %v2872_v53, %v2876_v61 }
0x1827   :  { %v2882_v34 = vmul.f32 1.442695, %v2880_v62 }
0x1828   :  { %v2897_v63 = vpop.permute.xlu0 %2896  ;;  %v2879_v2 = vpop.xlane.xlu1 %2878 }
0x1829   :  { %4826 = vpow2.f32 %v2882_v34  ;;  %v2881_v20 = vsub.f32 %v2873_v58, %v2879_v2  ;;  %4463 = vmatpush3.msra.mxu0 %v2897_v63  ;;  %v4044_v58 = vld [vmem:[%s5748_s6 + $0x38] sm:$0xff] }
0x182a   :  { %4472 = vmatprep.subr.mxu0 %v4878_v36  ;;  %v4652_v60 = vpack.c.bf16 %v4044_v58, %v4043_v39 }
0x182b   :  { %v2884_v3 = vmul.f32 1.442695, %v2881_v20 }
0x182c   :  { %v2973_v4 = vpop.permute.xlu1 %2972 }
0x182d   :  { %4828 = vpow2.f32 %v2884_v3  ;;  %4468 = vmatpush3.msra.mxu1 %v2973_v4 }
0x182e   :  { %4477 = vmatprep.subr.mxu1 %v4878_v36 }
0x1830   :  { %v3051_v12 = vpop.permute.xlu1 %3050 }
0x1833   :  { %v4827_v6 = vpop.eup %4826 }
0x1834   :  { %v2886_v7 = vsel %vm202_vm2, %v4827_v6, 0.0  ;;  %v3129_v16 = vpop.permute.xlu1 %3128 }
0x1835   :  { %2887 = vadd.xlane.f32.xlu0 %v2886_v7 }
0x1837   :  { %v4829_v8 = vpop.eup %4828 }
0x1838   :  { %v2889_v9 = vsel %vm202_vm2, %v4829_v8, 0.0  ;;  %v3127_v21 = vpop.permute.xlu1 %3126 }
0x1839   :  { %2890 = vadd.xlane.f32.xlu0 %v2889_v9 }
0x184f   :  { %3048 = vrot.lane.b32.xlu0 %v5354_v30, %s5780_s25 }
0x18c2   :  { %v2888_v10 = vpop.xlane.xlu0 %2887 }
0x18c3   :  { %4830 = vrcp.f32 %v2888_v10 }
0x18c6   :  { %v2891_v11 = vpop.xlane.xlu0 %2890 }
0x18c7   :  { %4832 = vrcp.f32 %v2891_v11 }
0x18ca   :  { %v3049_v19 = vpop.permute.xlu0 %3048 }
0x18cd   :  { %v4831_v13 = vpop.eup %4830 }
0x18ce   :  { %v2893_v14 = vmul.f32 %v4831_v13, %v4827_v6 }
0x18d0   :  { %4465 = vmatmul.mubr.msk.f32.vlgmr.msra.gmra.mrb[28].mxu0 %vm202_vm2, %v2893_v14 }
0x18d1   :  { %v4833_v15 = vpop.eup %4832  ;;  %4473 = vmatpush3.xpose.msk.msra.mxu0 %vm202_vm2, %v3051_v12  ;;  %4474 = vmatprep.mubr.msk.f32.mxu0 %vm4879_vm1, %v4878_v36 }
0x18d2   :  { %v2895_v17 = vmul.f32 %v4833_v15, %v4829_v8  ;;  %4482 = vmatprep.subr.mxu0 %v4878_v36 }
0x18d4   :  { %4470 = vmatmul.mubr.msk.f32.vlgmr.msra.gmra.mrb[34].mxu1 %vm202_vm2, %v2895_v17  ;;  %4475 = vmatmul.mubr.msk.f32.vlgmr.msra.gmra.mrb[30].mxu0 %vm202_vm2, %v3049_v19 }
0x18d5   :  { %4478 = vmatpush3.xpose.msk.msra.mxu1 %vm202_vm2, %v3129_v16  ;;  %4479 = vmatprep.mubr.msk.f32.mxu1 %vm4879_vm1, %v4878_v36 }
0x18d6   :  { %4487 = vmatprep.subr.mxu1 %v4878_v36  ;;  %4484 = vmatprep.mubr.msk.f32.mxu0 %vm4879_vm1, %v4878_v36 }
0x18d8   :  { %4480 = vmatmul.mubr.msk.f32.vlgmr.msra.gmra.mrb[36].mxu1 %vm202_vm2, %v3127_v21 }
0x18d9   :  { %4489 = vmatprep.mubr.msk.f32.mxu1 %vm4879_vm1, %v4878_v36 }
0x19a3   :  { %v2968_v22 = vpop.f32.mrb[28].mxu0 }
0x19a4   :  { %v4466_v23 = vpop.f32.mrb[29].mxu0 }
0x19a7   :  { %v3044_v24 = vpop.f32.mrb[34].mxu1  ;;  %v3122_v25 = vpop.f32.mrb[30].mxu0 }
0x19a8   :  { %v3204_v26 = vmul.f32 0.35355338, %v3122_v25  ;;  %v4471_v27 = vpop.f32.mrb[35].mxu1  ;;  %v4476_v28 = vpop.f32.mrb[31].mxu0 }
0x19aa   :  { %v3206_v18 = vsel %vm5048_vm3, %v3204_v26, -1e+30 }
0x19ab   :  { %v3200_v31 = vpop.f32.mrb[36].mxu1  ;;  %v3208_v32 = vsel %vm202_vm2, %v3206_v18, -inf }
0x19ac   :  { %v3205_v33 = vmul.f32 0.35355338, %v3200_v31  ;;  %3209 = vmax.xlane.f32.xlu0 %v3208_v32  ;;  %v4481_v35 = vpop.f32.mrb[37].mxu1  ;;  %v4053_v32 = vld [vmem:[%s5752_s10 + $0x20] sm:$0xff] }
0x19ae   :  { %v3207_v37 = vsel %vm5048_vm3, %v3205_v33, -1e+30  ;;  %v4054_v33 = vld [vmem:[%s5752_s10 + $0x28] sm:$0xff] }
0x19af   :  { %v3211_v36 = vsel %vm202_vm2, %v3207_v37, -inf  ;;  %v4656_v35 = vpack.c.bf16 %v4054_v33, %v4053_v32 }
0x19b0   :  { %3212 = vmax.xlane.f32.xlu1 %v3211_v36  ;;  %v4056_v36 = vld [vmem:[%s5752_s10 + $0x38] sm:$0xff] }
0x19c1   :  { %3306 = vrot.lane.b32.xlu1 %v5352_v29, %s5781_s26 }
0x19c5   :  { %3384 = vrot.lane.b32.xlu1 %v5452_v0, %s5782_s27 }
0x19c9   :  { %3386 = vrot.lane.b32.xlu1 %v5454_v47, %s5782_s27 }
0x19cd   :  { %3394 = vrot.lane.b32.xlu1 %v3044_v24, %s5783_s28 }
0x1a39   :  { %v3210_v38 = vpop.xlane.xlu0 %3209 }
0x1a3a   :  { %v3214_v40 = vsub.f32 %v3206_v18, %v3210_v38 }
0x1a3c   :  { %v3216_v42 = vmul.f32 1.442695, %v3214_v40  ;;  %v4061_v40 = vld [vmem:[%s5754_s12 + $0x80] sm:$0xff] }
0x1a3d   :  { %v3213_v43 = vpop.xlane.xlu1 %3212 }
0x1a3e   :  { %4834 = vpow2.f32 %v3216_v42  ;;  %v3215_v48 = vsub.f32 %v3207_v37, %v3213_v43  ;;  %v4055_v37 = vld [vmem:[%s5752_s10 + $0x30] sm:$0xff]  ;;  %v4062_v42 = vld [vmem:[%s5754_s12 + $0x88] sm:$0xff] }
0x1a3f   :  { %v4660_v38 = vpack.c.bf16 %v4056_v36, %v4055_v37  ;;  %v4063_v43 = vld [vmem:[%s5754_s12 + $0x90] sm:$0xff] }
0x1a40   :  { %v3218_v44 = vmul.f32 1.442695, %v3215_v48  ;;  %v4664_v48 = vpack.c.bf16 %v4062_v42, %v4061_v40 }
0x1a41   :  { %v3307_v1 = vpop.permute.xlu1 %3306 }
0x1a42   :  { %4836 = vpow2.f32 %v3218_v44  ;;  %4488 = vmatpush3.msra.mxu1 %v3307_v1  ;;  %v4064_v44 = vld [vmem:[%s5754_s12 + $0x98] sm:$0xff] }
0x1a43   :  { %4657 = vmatprep.subr.bf16.mxu1 %v4656_v35  ;;  %v4668_v1 = vpack.c.bf16 %v4064_v44, %v4063_v43  ;;  %v3804_v43 = vld [vmem:[%s5743_s1] sm:$0xff]  ;;  %v3806_v44 = vld [vmem:[%s5743_s1 + $0x10] sm:$0xff] }
0x1a45   :  { %v3385_v2 = vpop.permute.xlu1 %3384 }
0x1a46   :  { %v3406_v4 = vsel %vm202_vm2, %v5410_v5, %v3385_v2  ;;  %v4046_v5 = vld [vmem:[%s5749_s7 + $0x1] ss:$0 sm:$0xff] }
0x1a48   :  { %v4835_v45 = vpop.eup %4834 }
0x1a49   :  { %v3220_v29 = vsel %vm202_vm2, %v4835_v45, 0.0  ;;  %v3387_v20 = vpop.permute.xlu1 %3386 }
0x1a4a   :  { %3221 = vadd.xlane.f32.xlu0 %v3220_v29  ;;  %v3407_v10 = vsel %vm202_vm2, %v5412_v41, %v3387_v20  ;;  %v4066_v29 = vld [vmem:[%s5754_s12 + $0xa8] sm:$0xff]  ;;  %v4069_v20 = vld [vmem:[%s5754_s12 + $0xc0] sm:$0xff] }
0x1a4c   :  { %v4837_v0 = vpop.eup %4836 }
0x1a4d   :  { %v3223_v46 = vsel %vm202_vm2, %v4837_v0, 0.0  ;;  %v3395_v6 = vpop.permute.xlu1 %3394 }
0x1a4e   :  { %3224 = vadd.xlane.f32.xlu0 %v3223_v46  ;;  %v3409_v11 = vsel %vm1562_vm5, %v3407_v10, %v3395_v6  ;;  %v4071_v6 = vld [vmem:[%s5754_s12 + $0xd0] sm:$0xff]  ;;  %v4074_v10 = vld [vmem:[%s5754_s12 + $0xe8] sm:$0xff] }
0x1a64   :  { %3230 = vrot.lane.b32.xlu0 %v5354_v30, %s5781_s26  ;;  %v4041_v30 = vld [vmem:[%s5748_s6 + $0x20] sm:$0xff] }
0x1a65   :  { %v4648_v59 = vpack.c.bf16 %v4042_v57, %v4041_v30  ;;  %v4052_v57 = vld [vmem:[%s5751_s9 + $0x1] ss:$0 sm:$0xff] }
0x1a68   :  { %3392 = vrot.lane.b32.xlu0 %v2968_v22, %s5783_s28  ;;  %s4894_s28 = smov [#allocation2]  }
0x1a69   :  { %s3956_s29 = sshll.u32 %s4894_s28, 4  ;;  %s3957_s29 = int_to_ptr.vmem [resolvable:$true] %s3956_s29 }
0x1a6a   :  { %p4859_p1 = scmp.lt.s32.totalorder %s3957_s29, %s3957_s29 }
0x1ad7   :  { %v3222_v47 = vpop.xlane.xlu0 %3221 }
0x1ad8   :  { %4838 = vrcp.f32 %v3222_v47 }
0x1adb   :  { %v3225_v49 = vpop.xlane.xlu0 %3224 }
0x1adc   :  { %4840 = vrcp.f32 %v3225_v49 }
0x1adf   :  { %v3231_v50 = vpop.permute.xlu0 %3230 }
0x1ae0   :  { %4483 = vmatpush3.msra.mxu0 %v3231_v50 }
0x1ae1   :  { %4649 = vmatprep.subr.bf16.mxu0 %v4648_v59 }
0x1ae2   :  { %v4839_v51 = vpop.eup %4838 }
0x1ae3   :  { %v3227_v52 = vmul.f32 %v4839_v51, %v4835_v45  ;;  %v3393_v3 = vpop.permute.xlu0 %3392  ;;  %v4065_v45 = vld [vmem:[%s5754_s12 + $0xa0] sm:$0xff] }
0x1ae4   :  { %v3408_v7 = vsel %vm1562_vm5, %v3406_v4, %v3393_v3  ;;  %v4070_v3 = vld [vmem:[%s5754_s12 + $0xc8] sm:$0xff] }
0x1ae5   :  { %4485 = vmatmul.mubr.msk.f32.vlgmr.msra.gmra.mrb[32].mxu0 %vm202_vm2, %v3227_v52  ;;  %v4680_v4 = vpack.c.bf16 %v4070_v3, %v4069_v20  ;;  %v3816_v3 = vld [vmem:[%s5743_s1 + $0x60] sm:$0xff] }
0x1ae6   :  { %v4841_v53 = vpop.eup %4840  ;;  %4651 = vmatpush3.bf16.msra.mxu0 %v4648_v59 }
0x1ae7   :  { %v3229_v54 = vmul.f32 %v4841_v53, %v4837_v0  ;;  %4653 = vmatprep.subr.bf16.mxu0 %v4652_v60  ;;  %v4672_v0 = vpack.c.bf16 %v4066_v29, %v4065_v45  ;;  %v3808_v29 = vld [vmem:[%s5743_s1 + $0x20] sm:$0xff] }
0x1ae9   :  { %4490 = vmatmul.mubr.msk.f32.vlgmr.msra.gmra.mrb[38].mxu1 %vm202_vm2, %v3229_v54  ;;  %v4051_v54 = vld [vmem:[%s5750_s8 + $0x1] ss:$0 sm:$0xff] }
0x1aea   :  { %4655 = vmatpush3.bf16.msra.mxu0 %v4652_v60  ;;  %4659 = vmatpush3.bf16.msra.mxu1 %v4656_v35 }
0x1aeb   :  { %4661 = vmatprep.subr.bf16.mxu1 %v4660_v38  ;;  %4665 = vmatprep.subr.bf16.mxu0 %v4664_v48 }
0x1aee   :  { %4663 = vmatpush3.bf16.msra.mxu1 %v4660_v38 }
0x1bb8   :  { %v3302_v61 = vpop.f32.mrb[32].mxu0 }
0x1bb9   :  { %3400 = vrot.lane.b32.xlu0 %v3302_v61, %s5784_s20  ;;  %v4486_v62 = vpop.f32.mrb[33].mxu0 }
0x1bbc   :  { %v3378_v34 = vpop.f32.mrb[38].mxu1 }
0x1bbd   :  { %3402 = vrot.lane.b32.xlu1 %v3378_v34, %s5784_s20  ;;  %v4491_v63 = vpop.f32.mrb[39].mxu1  ;;  %v4067_v34 = vld [vmem:[%s5754_s12 + $0xb0] sm:$0xff] }
0x1bbe   :  { %v4068_v63 = vld [vmem:[%s5754_s12 + $0xb8] sm:$0xff] }
0x1bbf   :  { %v4676_v2 = vpack.c.bf16 %v4068_v63, %v4067_v34 }
0x1c2b   :  { %v3401_v8 = vpop.permute.xlu0 %3400 }
0x1c2c   :  { %v3410_v9 = vsel %vm1565_vm4, %v3408_v7, %v3401_v8  ;;  %v4072_v7 = vld [vmem:[%s5754_s12 + $0xd8] sm:$0xff] }
0x1c2d   :  { %4500 = vmatprep.mubr.msk.f32.mxu0 %vm63_vm0, %v3410_v9  ;;  %v4684_v8 = vpack.c.bf16 %v4072_v7, %v4071_v6  ;;  %v4073_v9 = vld [vmem:[%s5754_s12 + $0xe0] sm:$0xff]  ;;  %v3818_v7 = vld [vmem:[%s5743_s1 + $0x70] sm:$0xff] }
0x1c2f   :  { %v3403_v12 = vpop.permute.xlu1 %3402 }
0x1c30   :  { %v3411_v13 = vsel %vm1565_vm4, %v3409_v11, %v3403_v12  ;;  %v4688_v11 = vpack.c.bf16 %v4074_v10, %v4073_v9  ;;  %v4075_v12 = vld [vmem:[%s5754_s12 + $0xf0] sm:$0xff] }
0x1c31   :  { %4501 = vmatmul.mubr.msk.f32.vlgmr.msra.gmra.mrb[34].mxu0 %vm63_vm0, %v3411_v13  ;;  %v4076_v13 = vld [vmem:[%s5754_s12 + $0xf8] sm:$0xff] }
0x1c32   :  { %4667 = vmatpush3.bf16.msra.mxu0 %v4664_v48  ;;  %v3805_v48 = vld [vmem:[%s5743_s1 + $0x8] sm:$0xff] }
0x1c33   :  { %4669 = vmatprep.subr.bf16.mxu0 %v4668_v1 }
0x1c36   :  { %4671 = vmatpush3.bf16.msra.mxu0 %v4668_v1  ;;  %v3807_v1 = vld [vmem:[%s5743_s1 + $0x18] sm:$0xff] }
0x1c37   :  { %4673 = vmatprep.subr.bf16.mxu0 %v4672_v0  ;;  %v4702_v45 = vpack.c.bf16 %v3807_v1, %v3806_v44 }
0x1c3a   :  { %4675 = vmatpush3.bf16.msra.mxu0 %v4672_v0  ;;  %v3809_v0 = vld [vmem:[%s5743_s1 + $0x28] sm:$0xff] }
0x1c3b   :  { %4677 = vmatprep.subr.bf16.mxu0 %v4676_v2 }
0x1c3e   :  { %4679 = vmatpush3.bf16.msra.mxu0 %v4676_v2 }
0x1c3f   :  { %4681 = vmatprep.subr.bf16.mxu0 %v4680_v4 }
0x1c42   :  { %4683 = vmatpush3.bf16.msra.mxu0 %v4680_v4  ;;  %v3817_v4 = vld [vmem:[%s5743_s1 + $0x68] sm:$0xff] }
0x1c43   :  { %4685 = vmatprep.subr.bf16.mxu0 %v4684_v8  ;;  %v4732_v6 = vpack.c.bf16 %v3817_v4, %v3816_v3 }
0x1c46   :  { %4687 = vmatpush3.bf16.msra.mxu0 %v4684_v8  ;;  %v3819_v8 = vld [vmem:[%s5743_s1 + $0x78] sm:$0xff] }
0x1c47   :  { %4689 = vmatprep.subr.bf16.mxu0 %v4688_v11  ;;  %v4738_v9 = vpack.c.bf16 %v3819_v8, %v3818_v7 }
0x1c4a   :  { %4691 = vmatpush3.bf16.msra.mxu0 %v4688_v11 }
0x1d04   :  { %v4502_v14 = vpop.f32.mrb[34].mxu0 }
0x1d05   :  { %v3503_v15 = vadd.f32 %v4502_v14, %v4046_v5  ;;  %v3497_v16 = vpop.f32.mrb[35].mxu0  ;;  %v4058_v14 = vld [vmem:[%s5753_s11 + $0x1] ss:$0 sm:$0xff] }
0x1d06   :  { %v3498_v17 = vadd.f32 %v4046_v5, %v3497_v16  ;;  %v4692_v5 = vpack.c.bf16 %v4076_v13, %v4075_v12 }
0x1d07   :  { %v5542_v19 = vadd.f32 %v3503_v15, %v5313_v55 }
0x1d08   :  { %v5545_v41 = vadd.f32 %v3498_v17, %v5316_v56  ;;  %4693 = vmatprep.subr.bf16.mxu0 %v4692_v5 }
0x1d09   :  { %v3515_v21 = vsel %vm63_vm0, %v5542_v19, 0.0  ;;  %4695 = vmatpush3.bf16.msra.mxu0 %v4692_v5 }
0x1d0a   :  { %3516 = vadd.xlane.f32.xlu1 %v3515_v21  ;;  %v3512_v22 = vsel %vm63_vm0, %v5545_v41, 0.0 }
0x1d0b   :  { %3513 = vadd.xlane.f32.xlu0 %v3512_v22 }
0x1d97   :  { %v3517_v23 = vpop.xlane.xlu1 %3516 }
0x1d98   :  { %v3519_v24 = vmul.f32 0.03125, %v3517_v23  ;;  %v3514_v25 = vpop.xlane.xlu0 %3513 }
0x1d99   :  { %v3518_v26 = vmul.f32 0.03125, %v3514_v25 }
0x1d9a   :  { %v3521_v27 = vsub.f32 %v5542_v19, %v3519_v24 }
0x1d9b   :  { %v3520_v55 = vsub.f32 %v5545_v41, %v3518_v26 }
0x1d9c   :  { %v3523_v18 = vmul.f32 %v3521_v27, %v3521_v27 }
0x1d9d   :  { %v3522_v28 = vmul.f32 %v3520_v55, %v3520_v55 }
0x1d9e   :  { %v3527_v31 = vsel %vm63_vm0, %v3523_v18, 0.0 }
0x1d9f   :  { %v3524_v56 = vsel %vm63_vm0, %v3522_v28, 0.0 }
0x1da0   :  { %3525 = vadd.xlane.f32.xlu0 %v3524_v56 }
0x1da4   :  { %3528 = vadd.xlane.f32.xlu0 %v3527_v31  ;;  %v4078_v31 = vld [vmem:[%s5755_s13 + $0x1] ss:$0 sm:$0xff] }
0x1e2d   :  { %v3526_v46 = vpop.xlane.xlu0 %3525 }
0x1e2e   :  { %v3530_v47 = vmul.f32 0.03125, %v3526_v46  ;;  %v4708_v46 = vpack.c.bf16 %v3809_v0, %v3808_v29 }
0x1e30   :  { %v3532_v49 = vadd.f32 1e-05, %v3530_v47  ;;  %v3810_v47 = vld [vmem:[%s5743_s1 + $0x30] sm:$0xff] }
0x1e31   :  { %v3529_v50 = vpop.xlane.xlu0 %3528 }
0x1e32   :  { %4842 = vrsqrt.f32 %v3532_v49  ;;  %v3531_v51 = vmul.f32 0.03125, %v3529_v50  ;;  %v3811_v49 = vld [vmem:[%s5743_s1 + $0x38] sm:$0xff] }
0x1e33   :  { %v4714_v50 = vpack.c.bf16 %v3811_v49, %v3810_v47 }
0x1e34   :  { %v3533_v52 = vadd.f32 1e-05, %v3531_v51  ;;  %v3812_v51 = vld [vmem:[%s5743_s1 + $0x40] sm:$0xff] }
0x1e36   :  { %4844 = vrsqrt.f32 %v3533_v52  ;;  %v3813_v52 = vld [vmem:[%s5743_s1 + $0x48] sm:$0xff] }
0x1e3c   :  { %v4843_v53 = vpop.eup %4842 }
0x1e3d   :  { %v3536_v30 = vmul.f32 %v4843_v53, %v3520_v55  ;;  %v4720_v53 = vpack.c.bf16 %v3813_v52, %v3812_v51 }
0x1e3f   :  { %v3544_v59 = vmul.f32 %v4051_v54, %v3536_v30  ;;  %v3815_v30 = vld [vmem:[%s5743_s1 + $0x58] sm:$0xff] }
0x1e40   :  { %v4845_v39 = vpop.eup %4844 }
0x1e41   :  { %v3537_v58 = vmul.f32 %v4845_v39, %v3521_v27  ;;  %v3552_v60 = vadd.f32 %v4052_v57, %v3544_v59 }
0x1e43   :  { %v3545_v61 = vmul.f32 %v4051_v54, %v3537_v58  ;;  %4511 = vmatprep.mubr.msk.f32.mxu1 %vm63_vm0, %v3552_v60  ;;  %v3814_v54 = vld [vmem:[%s5743_s1 + $0x50] sm:$0xff] }
0x1e45   :  { %v3553_v62 = vadd.f32 %v4052_v57, %v3545_v61  ;;  %v4726_v57 = vpack.c.bf16 %v3815_v30, %v3814_v54 }
0x1e47   :  { %4512 = vmatmul.mubr.msk.f32.vlgmr.msra.gmra.mrb[40].mxu1 %vm63_vm0, %v3553_v62 }
0x1f1a   :  { %v4513_v15 = vpop.f32.mrb[40].mxu1 }
0x1f1b   :  { %v3645_v16 = vadd.f32 %v4513_v15, %v4058_v14  ;;  %v3639_v17 = vpop.f32.mrb[41].mxu1 }
0x1f1c   :  { %v3640_v21 = vadd.f32 %v4058_v14, %v3639_v17 }
0x1f1d   :  { %v3651_v22 = vmul.f32 0.70710677, %v3645_v16  ;;  %v3649_v28 = vmul.f32 0.5, %v3645_v16  ;;  %v4079_v16 = vld [vmem:[%s5756_s14] ss:$0 sm:$0xff]  ;;  %s4854_s14 = scalar_lea.vmem %s3957_s29, 256 }
0x1f1e   :  { %v3650_v23 = vmul.f32 0.70710677, %v3640_v21  ;;  %v3648_v27 = vmul.f32 0.5, %v3640_v21  ;;  %p4855_p0 = scmp.ne.s32.totalorder %s3957_s29, %s4854_s14  ;;  %p4860_p2 = scmp.lt.s32.totalorder %s4854_s14, %s4854_s14 }
0x1f1f   :  { %4846 = verf.f32 %v3651_v22 }
0x1f20   :  { %4848 = verf.f32 %v3650_v23  ;;  %v4080_v23 = vld [vmem:[%s5757_s15] ss:$0 sm:$0xff]  ;;  %p4861_p3 = por %p4860_p2, %p4859_p1 }
0x1f22   :  { %p4862_p4 = pnand %p4861_p3, %p4855_p0 }
0x1f29   :  { %v4847_v24 = vpop.eup %4846 }
0x1f2a   :  { %v4849_v25 = vpop.eup %4848  ;;  %v3655_v26 = vadd.f32 1.0, %v4847_v24 }
0x1f2b   :  { %v3654_v55 = vadd.f32 1.0, %v4849_v25 }
0x1f2c   :  { %v3657_v18 = vmul.f32 %v3655_v26, %v3649_v28 }
0x1f2d   :  { %v3656_v56 = vmul.f32 %v3654_v55, %v3648_v27 }
0x1f2f   :  { %4546 = vmatprep.mubr.f32.mxu0 %v3656_v56 }
0x1f30   :  { %4547 = vmatmul.mubr.f32.vlgmr.msra.gmra.mrb[36].mxu0 %v3657_v18 }
0x2003   :  { %v4548_v32 = vpop.f32.mrb[36].mxu0 }
0x2004   :  { %v3755_v33 = vadd.f32 %v4548_v32, %v4078_v31  ;;  %v3749_v35 = vpop.f32.mrb[37].mxu0 }
0x2005   :  { %v3750_v37 = vadd.f32 %v4078_v31, %v3749_v35 }
0x2006   :  { %v3759_v36 = vadd.f32 %v3755_v33, %v5542_v19 }
0x2007   :  { %v3758_v38 = vadd.f32 %v3750_v37, %v5545_v41  ;;  %v4696_v41 = vpack.c.bf16 %v3805_v48, %v3804_v43 }
0x2008   :  { %v3765_v40 = vsel %vm63_vm0, %v3759_v36, 0.0 }
0x2009   :  { %3766 = vadd.xlane.f32.xlu1 %v3765_v40  ;;  %v3762_v42 = vsel %vm63_vm0, %v3758_v38, 0.0  ;;  %4698 = vmatprep.subr.msk.bf16.mxu1 %vm5641_vm6, %v4696_v41 }
0x200a   :  { %3763 = vadd.xlane.f32.xlu0 %v3762_v42  ;;  %4701 = vmatpush3.bf16.xpose.msk.msra.mxu1 %vm5641_vm6, %v4696_v41 }
0x200b   :  { %4704 = vmatprep.subr.msk.bf16.mxu1 %vm5641_vm6, %v4702_v45 }
0x2012   :  { %4707 = vmatpush3.bf16.xpose.msk.msra.mxu1 %vm5641_vm6, %v4702_v45 }
0x2013   :  { %4710 = vmatprep.subr.msk.bf16.mxu1 %vm5641_vm6, %v4708_v46 }
0x201a   :  { %4713 = vmatpush3.bf16.xpose.msk.msra.mxu1 %vm5641_vm6, %v4708_v46 }
0x201b   :  { %4716 = vmatprep.subr.msk.bf16.mxu1 %vm5641_vm6, %v4714_v50 }
0x2022   :  { %4719 = vmatpush3.bf16.xpose.msk.msra.mxu1 %vm5641_vm6, %v4714_v50 }
0x2023   :  { %4722 = vmatprep.subr.msk.bf16.mxu1 %vm5641_vm6, %v4720_v53 }
0x202a   :  { %4725 = vmatpush3.bf16.xpose.msk.msra.mxu1 %vm5641_vm6, %v4720_v53 }
0x202b   :  { %4728 = vmatprep.subr.msk.bf16.mxu1 %vm5641_vm6, %v4726_v57 }
0x2032   :  { %4731 = vmatpush3.bf16.xpose.msk.msra.mxu1 %vm5641_vm6, %v4726_v57 }
0x2033   :  { %4734 = vmatprep.subr.msk.bf16.mxu1 %vm5641_vm6, %v4732_v6 }
0x203a   :  { %4737 = vmatpush3.bf16.xpose.msk.msra.mxu1 %vm5641_vm6, %v4732_v6 }
0x203b   :  { %4740 = vmatprep.subr.msk.bf16.mxu1 %vm5641_vm6, %v4738_v9 }
0x2042   :  { %4743 = vmatpush3.bf16.xpose.msk.msra.mxu1 %vm5641_vm6, %v4738_v9 }
0x2096   :  { %v3767_v59 = vpop.xlane.xlu1 %3766 }
0x2097   :  { %v3769_v39 = vmul.f32 0.03125, %v3767_v59  ;;  %v3764_v58 = vpop.xlane.xlu0 %3763 }
0x2098   :  { %v3768_v60 = vmul.f32 0.03125, %v3764_v58 }
0x2099   :  { %v3771_v61 = vsub.f32 %v3759_v36, %v3769_v39 }
0x209a   :  { %v3770_v62 = vsub.f32 %v3758_v38, %v3768_v60 }
0x209b   :  { %v3773_v34 = vmul.f32 %v3771_v61, %v3771_v61 }
0x209c   :  { %v3772_v63 = vmul.f32 %v3770_v62, %v3770_v62 }
0x209d   :  { %v3777_v2 = vsel %vm63_vm0, %v3773_v34, 0.0 }
0x209e   :  { %3778 = vadd.xlane.f32.xlu1 %v3777_v2  ;;  %v3774_v20 = vsel %vm63_vm0, %v3772_v63, 0.0 }
0x209f   :  { %3775 = vadd.xlane.f32.xlu0 %v3774_v20 }
0x212b   :  { %v3779_v10 = vpop.xlane.xlu1 %3778 }
0x212c   :  { %v3781_v11 = vmul.f32 0.03125, %v3779_v10  ;;  %v3776_v12 = vpop.xlane.xlu0 %3775 }
0x212d   :  { %v3780_v13 = vmul.f32 0.03125, %v3776_v12 }
0x212e   :  { %v3783_v5 = vadd.f32 1e-05, %v3781_v11 }
0x212f   :  { %v3782_v14 = vadd.f32 1e-05, %v3780_v13 }
0x2130   :  { %4850 = vrsqrt.f32 %v3783_v5 }
0x2131   :  { %4852 = vrsqrt.f32 %v3782_v14 }
0x213a   :  { %v4851_v15 = vpop.eup %4850 }
0x213b   :  { %v4853_v17 = vpop.eup %4852  ;;  %v3787_v21 = vmul.f32 %v4851_v15, %v3771_v61 }
0x213c   :  { %v3786_v22 = vmul.f32 %v4853_v17, %v3770_v62 }
0x213d   :  { %v3795_v24 = vmul.f32 %v4079_v16, %v3787_v21 }
0x213e   :  { %v3794_v25 = vmul.f32 %v4079_v16, %v3786_v22 }
0x213f   :  { %v3803_v27 = vadd.f32 %v4080_v23, %v3795_v24 }
0x2140   :  { %v3802_v26 = vadd.f32 %v4080_v23, %v3794_v25 }
0x2142   :  { %4581 = vmatprep.mubr.msk.f32.mxu1 %vm63_vm0, %v3802_v26 }
0x2143   :  { %4582 = vmatmul.mubr.msk.f32.vlgmr.msra.gmra.mrb[42].mxu1 %vm63_vm0, %v3803_v27 }
0x2216   :  { %v4583_v55 = vpop.f32.mrb[42].mxu1 }
0x2217   :  { %3950 = vst [vmem:[#allocation2 + $0x8] sm:$0xff] %v4583_v55  ;;  %v3940_v28 = vpop.f32.mrb[43].mxu1 }
0x2218   :  { %3949 = vst [vmem:[#allocation2] sm:$0xff] %v3940_v28 }
0x2219   :  { %4865 = shalt.err (!%p4862_p4)
}
0x221a   :  { %s4866_s0 = scalar_lea.hbm %s5758_s16, 256 }
0x221b   :  { %p4867_p5 = scmp.ne.s32.totalorder %s5758_s16, %s4866_s0  ;;  %p4870_p6 = scmp.lt.u32.totalorder %s4866_s0, %s5758_s16 }
0x221d   :  { %p4872_p7 = pnand %p4870_p6, %p4867_p5 }
0x221f   :  { %4875 = shalt.err (!%p4872_p7)
}
0x2220   :  { %s4895_s10 = smov 128  }
0x2221   :  { %3962 = dma.vmem_to_hbm [thread:$0]  %s3957_s29, 256, %s5758_s16, [#allocation3], %s4895_s10, %s4895_s10, %s5782_s27  }
0x2222   :  { %4876 = dma.done.wait [#allocation3], 256  }
0x2223   :  { %4877 = vsyncadd [#allocation3], 4294967040 }
0x2224   :  { %3966 = vsyncpa [#allocation3], 1 }

</bundles_post_ra>
